<compile_context>
chip_gen: v7x
topology: tpu7x:2x2x1
jax: 0.10.0
libtpu: 0.0.40
codegen_flags: <defaults>
</compile_context>

<pallas_src>
import functools
import math

import jax
import jax.numpy as jnp
from jax.experimental import pallas as pl
from jax.experimental.pallas import tpu as pltpu

EPS = 1e-5  # nn.BatchNorm2d default eps


def _refine_kernel(x_ref, row_ref, col_ref, gamma_ref, beta_ref,
                   w1_ref, b1_ref, w2_ref, b2_ref, out_ref, *, N, H, W):
    # x_ref:            (N*C, H*W) f32; row n*C + c = channel c of batch n,
    #                   lane axis = flat spatial index (fully dense vregs).
    # row_ref/col_ref:  (1, H*W) int32 pixel coordinates of each lane.
    # gamma/beta/b1/b2: (N*C, 1) f32 per-row columns (per-channel, tiled on N).
    # w1/w2:            (N*C, K_pad) f32 block-diagonal conv matrices; column
    #                   t*N*C + m*C + ci holds w[co, ci, t//3, t%3] on the
    #                   rows of batch m (zeros elsewhere, zero-padded to K_pad).
    # out_ref:          (N*C, H*W) f32
    NC, HW = x_ref.shape
    C = NC // N
    K_pad = w1_ref.shape[1]

    x = x_ref[...]
    gamma = gamma_ref[...]
    beta = beta_ref[...]
    row = row_ref[...]
    col = col_ref[...]

    # Per-tap lane shifts + boundary masks, computed once and shared by both
    # convs.  Tap t = (dy+1)*3 + (dx+1): result[p] = y[p + dy*W + dx], with
    # out-of-image contributions (SAME zero padding) killed by the mask.
    # pltpu.roll follows jnp.roll semantics (out[i] = in[i - shift]), so a
    # "read from p + off" view needs shift = (-off) % HW.
    taps_meta = []
    for dy in (-1, 0, 1):
        for dx in (-1, 0, 1):
            off = dy * W + dx
            if off == 0:
                taps_meta.append((0, None))
                continue
            mask = ((row + dy >= 0) & (row + dy < H) &
                    (col + dx >= 0) & (col + dx < W))       # (1, HW) bool
            taps_meta.append(((-off) % HW, mask))

    inv_count = 1.0 / (N * HW)

    def bn_relu(y):
        # nn.BatchNorm2d training-mode forward: per-channel batch mean and
        # biased variance over (N, H, W).  One fused sweep: sum & sum-of-sq.
        row_stats = jnp.concatenate(
            [jnp.sum(y, axis=1, keepdims=True),
             jnp.sum(y * y, axis=1, keepdims=True)], axis=1)        # (NC, 2)
        ch = row_stats[0:C]
        for n in range(1, N):
            ch = ch + row_stats[n * C:(n + 1) * C]                  # (C, 2)
        ch = jnp.concatenate([ch] * N, axis=0) * inv_count          # (NC, 2)
        mean = ch[:, 0:1]                                           # (NC, 1)
        var = jnp.maximum(ch[:, 1:2] - mean * mean, 0.0)            # biased
        scale = gamma * jax.lax.rsqrt(var + EPS)                    # (NC, 1)
        shift = beta - mean * scale
        return jnp.maximum(y * scale + shift, 0.0)                  # one FMA-ish

    def conv3x3(y, wmat, bias):
        # 9 masked lane rotations (XLU) stacked on sublanes, then a single MXU
        # contraction against the precomputed block-diagonal weight matrix.
        taps = []
        for shift, mask in taps_meta:
            shifted = y if shift == 0 else pltpu.roll(y, shift, axis=1)
            taps.append(shifted if mask is None
                        else jnp.where(mask, shifted, 0.0))
        if K_pad > 9 * NC:
            taps.append(jnp.zeros((K_pad - 9 * NC, HW), jnp.float32))
        stacked = jnp.concatenate(taps, axis=0)                     # (K_pad, HW)
        out = jnp.dot(wmat, stacked,
                      preferred_element_type=jnp.float32,
                      precision=jax.lax.Precision.HIGHEST)          # (NC, HW)
        return out + bias

    h = bn_relu(x)
    h = conv3x3(h, w1_ref[...], b1_ref[...])
    h = bn_relu(h)
    h = conv3x3(h, w2_ref[...], b2_ref[...])
    out_ref[...] = x + h


def _prep_inputs(x_nchw, params):
    """Layout plumbing done once in the wrapper (plain XLA, outside kernel)."""
    N, C, H, W = x_nchw.shape
    NC, HW = N * C, H * W
    gamma, beta, w1, b1, w2, b2 = params        # w: (C, C, 3, 3) OIHW, b: (C,)
    K = 9 * NC
    K_pad = pl.cdiv(K, 128) * 128               # lane-aligned contraction dim

    x = x_nchw.reshape(NC, HW).astype(jnp.float32)    # metadata-only reshape

    flat = jnp.arange(HW, dtype=jnp.int32)
    row_idx = (flat // W).reshape(1, HW)
    col_idx = (flat % W).reshape(1, HW)

    def per_row_col(v):                         # (C,) -> (NC, 1); row n*C+c -> v[c]
        return jnp.tile(v.astype(jnp.float32).reshape(C, 1), (N, 1))

    def conv_mat(w):                            # OIHW -> (NC, K_pad) block-diag
        w_flat = w.astype(jnp.float32).reshape(C, C, 9)        # (co, ci, tap)
        eye_n = jnp.eye(N, dtype=jnp.float32)
        m = jnp.einsum("oit,nm->notmi", w_flat, eye_n).reshape(NC, K)
        return jnp.pad(m, ((0, 0), (0, K_pad - K)))

    return (x, row_idx, col_idx, per_row_col(gamma), per_row_col(beta),
            conv_mat(w1), per_row_col(b1), conv_mat(w2), per_row_col(b2))


def refine_forward(x_nchw, params):
    """x_nchw: (N, C, H, W) float32 (PyTorch layout).  Returns (N, C, H, W)."""
    N, C, H, W = x_nchw.shape
    NC, HW = N * C, H * W
    inputs = _prep_inputs(x_nchw, params)

    vmem = pl.BlockSpec(memory_space=pltpu.MemorySpace.VMEM)
    out = pl.pallas_call(
        functools.partial(_refine_kernel, N=N, H=H, W=W),
        out_shape=jax.ShapeDtypeStruct((NC, HW), jnp.float32),
        in_specs=[vmem] * 9,
        out_specs=vmem,
        compiler_params=pltpu.CompilerParams(
            # True resident set is < 300 KiB; a few MiB leaves headroom for
            # compiler temporaries without crowding v7x's 64 MiB physical VMEM
            # when this op sits inside a larger graph.
            vmem_limit_bytes=4 * 1024 * 1024),
    )(*inputs)
    return out.reshape(N, C, H, W)


def refine_reference(x, params):
    """Pure-JAX reference (same semantics) for correctness checking."""
    gamma, beta, w1, b1, w2, b2 = params
    g = gamma.reshape(1, -1, 1, 1)
    b = beta.reshape(1, -1, 1, 1)

    def bn_relu(y):
        m = jnp.mean(y, axis=(0, 2, 3), keepdims=True)
        v = jnp.mean((y - m) ** 2, axis=(0, 2, 3), keepdims=True)
        return jnp.maximum((y - m) * jax.lax.rsqrt(v + EPS) * g + b, 0.0)

    def conv(y, w, bias):
        out = jax.lax.conv_general_dilated(
            y, w, window_strides=(1, 1), padding="SAME",
            dimension_numbers=("NCHW", "OIHW", "NCHW"),
            precision=jax.lax.Precision.HIGHEST)
        return out + bias.reshape(1, -1, 1, 1)

    h = conv(bn_relu(x), w1, b1)
    h = conv(bn_relu(h), w2, b2)
    return x + h


def make_params(planes, key):
    k1, k2, k3, k4, k5, k6 = jax.random.split(key, 6)
    gamma = jax.random.uniform(k1, (planes,), jnp.float32, 0.5, 1.5)
    beta = jax.random.uniform(k2, (planes,), jnp.float32, -0.5, 0.5)
    fan_in = planes * 3 * 3
    bound = 1.0 / math.sqrt(fan_in)
    w1 = jax.random.uniform(k3, (planes, planes, 3, 3), jnp.float32, -bound, bound)
    b1 = jax.random.uniform(k4, (planes,), jnp.float32, -bound, bound)
    w2 = jax.random.uniform(k5, (planes, planes, 3, 3), jnp.float32, -bound, bound)
    b2 = jax.random.uniform(k6, (planes,), jnp.float32, -bound, bound)
    return gamma, beta, w1, b1, w2, b2


if __name__ == "__main__":
    planes = 4
    N, H, W = 2, 16, 16
    key = jax.random.PRNGKey(0)
    kx, kp = jax.random.split(key)
    x = jax.random.normal(kx, (N, planes, H, W), jnp.float32)   # NCHW like PyTorch
    params = make_params(planes, kp)

    out = jax.block_until_ready(refine_forward(x, params))
    ref = jax.block_until_ready(refine_reference(x, params))

    assert out.shape == (N, planes, H, W)
    err = float(jnp.max(jnp.abs(out - ref)))
    assert jnp.allclose(out, ref, atol=2e-3, rtol=2e-3), f"max err {err}"
    print("KERNEL_OK")
</pallas_src>

<mosaic_0001>
module attributes {stable_mosaic.version = 11 : i64} {
  func.func @_refine_kernel(%arg0: memref<8x256xf32, #tpu.memory_space<vmem>>, %arg1: memref<1x256xi32, #tpu.memory_space<vmem>>, %arg2: memref<1x256xi32, #tpu.memory_space<vmem>>, %arg3: memref<8x1xf32, #tpu.memory_space<vmem>>, %arg4: memref<8x1xf32, #tpu.memory_space<vmem>>, %arg5: memref<8x128xf32, #tpu.memory_space<vmem>>, %arg6: memref<8x1xf32, #tpu.memory_space<vmem>>, %arg7: memref<8x128xf32, #tpu.memory_space<vmem>>, %arg8: memref<8x1xf32, #tpu.memory_space<vmem>>, %arg9: memref<8x256xf32, #tpu.memory_space<vmem>>) attributes {dimension_semantics = [], scalar_prefetch = 0 : i64, scratch_operands = 0 : i64, tpu.core_type = #tpu.core_type<tc>} {
    %c0 = arith.constant 0 : index
    %c0_0 = arith.constant 0 : index
    %0 = vector.load %arg0[%c0, %c0_0] : memref<8x256xf32, #tpu.memory_space<vmem>>, vector<8x256xf32>
    %c0_1 = arith.constant 0 : index
    %c0_2 = arith.constant 0 : index
    %1 = vector.load %arg3[%c0_1, %c0_2] : memref<8x1xf32, #tpu.memory_space<vmem>>, vector<8x1xf32>
    %c0_3 = arith.constant 0 : index
    %c0_4 = arith.constant 0 : index
    %2 = vector.load %arg4[%c0_3, %c0_4] : memref<8x1xf32, #tpu.memory_space<vmem>>, vector<8x1xf32>
    %c0_5 = arith.constant 0 : index
    %c0_6 = arith.constant 0 : index
    %3 = vector.load %arg1[%c0_5, %c0_6] : memref<1x256xi32, #tpu.memory_space<vmem>>, vector<1x256xi32>
    %c0_7 = arith.constant 0 : index
    %c0_8 = arith.constant 0 : index
    %4 = vector.load %arg2[%c0_7, %c0_8] : memref<1x256xi32, #tpu.memory_space<vmem>>, vector<1x256xi32>
    %c-1_i32 = arith.constant -1 : i32
    %5 = vector.broadcast %c-1_i32 : i32 to vector<1x256xi32>
    %6 = arith.addi %3, %5 : vector<1x256xi32>
    %c0_i32 = arith.constant 0 : i32
    %7 = vector.broadcast %c0_i32 : i32 to vector<1x256xi32>
    %8 = arith.cmpi sge, %6, %7 : vector<1x256xi32>
    %c-1_i32_9 = arith.constant -1 : i32
    %9 = vector.broadcast %c-1_i32_9 : i32 to vector<1x256xi32>
    %10 = arith.addi %3, %9 : vector<1x256xi32>
    %c16_i32 = arith.constant 16 : i32
    %11 = vector.broadcast %c16_i32 : i32 to vector<1x256xi32>
    %12 = arith.cmpi slt, %10, %11 : vector<1x256xi32>
    %13 = arith.andi %8, %12 : vector<1x256xi1>
    %c-1_i32_10 = arith.constant -1 : i32
    %14 = vector.broadcast %c-1_i32_10 : i32 to vector<1x256xi32>
    %15 = arith.addi %4, %14 : vector<1x256xi32>
    %c0_i32_11 = arith.constant 0 : i32
    %16 = vector.broadcast %c0_i32_11 : i32 to vector<1x256xi32>
    %17 = arith.cmpi sge, %15, %16 : vector<1x256xi32>
    %18 = arith.andi %13, %17 : vector<1x256xi1>
    %c-1_i32_12 = arith.constant -1 : i32
    %19 = vector.broadcast %c-1_i32_12 : i32 to vector<1x256xi32>
    %20 = arith.addi %4, %19 : vector<1x256xi32>
    %c16_i32_13 = arith.constant 16 : i32
    %21 = vector.broadcast %c16_i32_13 : i32 to vector<1x256xi32>
    %22 = arith.cmpi slt, %20, %21 : vector<1x256xi32>
    %23 = arith.andi %18, %22 : vector<1x256xi1>
    %c-1_i32_14 = arith.constant -1 : i32
    %24 = vector.broadcast %c-1_i32_14 : i32 to vector<1x256xi32>
    %25 = arith.addi %3, %24 : vector<1x256xi32>
    %c0_i32_15 = arith.constant 0 : i32
    %26 = vector.broadcast %c0_i32_15 : i32 to vector<1x256xi32>
    %27 = arith.cmpi sge, %25, %26 : vector<1x256xi32>
    %c-1_i32_16 = arith.constant -1 : i32
    %28 = vector.broadcast %c-1_i32_16 : i32 to vector<1x256xi32>
    %29 = arith.addi %3, %28 : vector<1x256xi32>
    %c16_i32_17 = arith.constant 16 : i32
    %30 = vector.broadcast %c16_i32_17 : i32 to vector<1x256xi32>
    %31 = arith.cmpi slt, %29, %30 : vector<1x256xi32>
    %32 = arith.andi %27, %31 : vector<1x256xi1>
    %c0_i32_18 = arith.constant 0 : i32
    %33 = vector.broadcast %c0_i32_18 : i32 to vector<1x256xi32>
    %34 = arith.addi %4, %33 : vector<1x256xi32>
    %c0_i32_19 = arith.constant 0 : i32
    %35 = vector.broadcast %c0_i32_19 : i32 to vector<1x256xi32>
    %36 = arith.cmpi sge, %34, %35 : vector<1x256xi32>
    %37 = arith.andi %32, %36 : vector<1x256xi1>
    %c0_i32_20 = arith.constant 0 : i32
    %38 = vector.broadcast %c0_i32_20 : i32 to vector<1x256xi32>
    %39 = arith.addi %4, %38 : vector<1x256xi32>
    %c16_i32_21 = arith.constant 16 : i32
    %40 = vector.broadcast %c16_i32_21 : i32 to vector<1x256xi32>
    %41 = arith.cmpi slt, %39, %40 : vector<1x256xi32>
    %42 = arith.andi %37, %41 : vector<1x256xi1>
    %c-1_i32_22 = arith.constant -1 : i32
    %43 = vector.broadcast %c-1_i32_22 : i32 to vector<1x256xi32>
    %44 = arith.addi %3, %43 : vector<1x256xi32>
    %c0_i32_23 = arith.constant 0 : i32
    %45 = vector.broadcast %c0_i32_23 : i32 to vector<1x256xi32>
    %46 = arith.cmpi sge, %44, %45 : vector<1x256xi32>
    %c-1_i32_24 = arith.constant -1 : i32
    %47 = vector.broadcast %c-1_i32_24 : i32 to vector<1x256xi32>
    %48 = arith.addi %3, %47 : vector<1x256xi32>
    %c16_i32_25 = arith.constant 16 : i32
    %49 = vector.broadcast %c16_i32_25 : i32 to vector<1x256xi32>
    %50 = arith.cmpi slt, %48, %49 : vector<1x256xi32>
    %51 = arith.andi %46, %50 : vector<1x256xi1>
    %c1_i32 = arith.constant 1 : i32
    %52 = vector.broadcast %c1_i32 : i32 to vector<1x256xi32>
    %53 = arith.addi %4, %52 : vector<1x256xi32>
    %c0_i32_26 = arith.constant 0 : i32
    %54 = vector.broadcast %c0_i32_26 : i32 to vector<1x256xi32>
    %55 = arith.cmpi sge, %53, %54 : vector<1x256xi32>
    %56 = arith.andi %51, %55 : vector<1x256xi1>
    %c1_i32_27 = arith.constant 1 : i32
    %57 = vector.broadcast %c1_i32_27 : i32 to vector<1x256xi32>
    %58 = arith.addi %4, %57 : vector<1x256xi32>
    %c16_i32_28 = arith.constant 16 : i32
    %59 = vector.broadcast %c16_i32_28 : i32 to vector<1x256xi32>
    %60 = arith.cmpi slt, %58, %59 : vector<1x256xi32>
    %61 = arith.andi %56, %60 : vector<1x256xi1>
    %c0_i32_29 = arith.constant 0 : i32
    %62 = vector.broadcast %c0_i32_29 : i32 to vector<1x256xi32>
    %63 = arith.addi %3, %62 : vector<1x256xi32>
    %c0_i32_30 = arith.constant 0 : i32
    %64 = vector.broadcast %c0_i32_30 : i32 to vector<1x256xi32>
    %65 = arith.cmpi sge, %63, %64 : vector<1x256xi32>
    %c0_i32_31 = arith.constant 0 : i32
    %66 = vector.broadcast %c0_i32_31 : i32 to vector<1x256xi32>
    %67 = arith.addi %3, %66 : vector<1x256xi32>
    %c16_i32_32 = arith.constant 16 : i32
    %68 = vector.broadcast %c16_i32_32 : i32 to vector<1x256xi32>
    %69 = arith.cmpi slt, %67, %68 : vector<1x256xi32>
    %70 = arith.andi %65, %69 : vector<1x256xi1>
    %c-1_i32_33 = arith.constant -1 : i32
    %71 = vector.broadcast %c-1_i32_33 : i32 to vector<1x256xi32>
    %72 = arith.addi %4, %71 : vector<1x256xi32>
    %c0_i32_34 = arith.constant 0 : i32
    %73 = vector.broadcast %c0_i32_34 : i32 to vector<1x256xi32>
    %74 = arith.cmpi sge, %72, %73 : vector<1x256xi32>
    %75 = arith.andi %70, %74 : vector<1x256xi1>
    %c-1_i32_35 = arith.constant -1 : i32
    %76 = vector.broadcast %c-1_i32_35 : i32 to vector<1x256xi32>
    %77 = arith.addi %4, %76 : vector<1x256xi32>
    %c16_i32_36 = arith.constant 16 : i32
    %78 = vector.broadcast %c16_i32_36 : i32 to vector<1x256xi32>
    %79 = arith.cmpi slt, %77, %78 : vector<1x256xi32>
    %80 = arith.andi %75, %79 : vector<1x256xi1>
    %c0_i32_37 = arith.constant 0 : i32
    %81 = vector.broadcast %c0_i32_37 : i32 to vector<1x256xi32>
    %82 = arith.addi %3, %81 : vector<1x256xi32>
    %c0_i32_38 = arith.constant 0 : i32
    %83 = vector.broadcast %c0_i32_38 : i32 to vector<1x256xi32>
    %84 = arith.cmpi sge, %82, %83 : vector<1x256xi32>
    %c0_i32_39 = arith.constant 0 : i32
    %85 = vector.broadcast %c0_i32_39 : i32 to vector<1x256xi32>
    %86 = arith.addi %3, %85 : vector<1x256xi32>
    %c16_i32_40 = arith.constant 16 : i32
    %87 = vector.broadcast %c16_i32_40 : i32 to vector<1x256xi32>
    %88 = arith.cmpi slt, %86, %87 : vector<1x256xi32>
    %89 = arith.andi %84, %88 : vector<1x256xi1>
    %c1_i32_41 = arith.constant 1 : i32
    %90 = vector.broadcast %c1_i32_41 : i32 to vector<1x256xi32>
    %91 = arith.addi %4, %90 : vector<1x256xi32>
    %c0_i32_42 = arith.constant 0 : i32
    %92 = vector.broadcast %c0_i32_42 : i32 to vector<1x256xi32>
    %93 = arith.cmpi sge, %91, %92 : vector<1x256xi32>
    %94 = arith.andi %89, %93 : vector<1x256xi1>
    %c1_i32_43 = arith.constant 1 : i32
    %95 = vector.broadcast %c1_i32_43 : i32 to vector<1x256xi32>
    %96 = arith.addi %4, %95 : vector<1x256xi32>
    %c16_i32_44 = arith.constant 16 : i32
    %97 = vector.broadcast %c16_i32_44 : i32 to vector<1x256xi32>
    %98 = arith.cmpi slt, %96, %97 : vector<1x256xi32>
    %99 = arith.andi %94, %98 : vector<1x256xi1>
    %c1_i32_45 = arith.constant 1 : i32
    %100 = vector.broadcast %c1_i32_45 : i32 to vector<1x256xi32>
    %101 = arith.addi %3, %100 : vector<1x256xi32>
    %c0_i32_46 = arith.constant 0 : i32
    %102 = vector.broadcast %c0_i32_46 : i32 to vector<1x256xi32>
    %103 = arith.cmpi sge, %101, %102 : vector<1x256xi32>
    %c1_i32_47 = arith.constant 1 : i32
    %104 = vector.broadcast %c1_i32_47 : i32 to vector<1x256xi32>
    %105 = arith.addi %3, %104 : vector<1x256xi32>
    %c16_i32_48 = arith.constant 16 : i32
    %106 = vector.broadcast %c16_i32_48 : i32 to vector<1x256xi32>
    %107 = arith.cmpi slt, %105, %106 : vector<1x256xi32>
    %108 = arith.andi %103, %107 : vector<1x256xi1>
    %c-1_i32_49 = arith.constant -1 : i32
    %109 = vector.broadcast %c-1_i32_49 : i32 to vector<1x256xi32>
    %110 = arith.addi %4, %109 : vector<1x256xi32>
    %c0_i32_50 = arith.constant 0 : i32
    %111 = vector.broadcast %c0_i32_50 : i32 to vector<1x256xi32>
    %112 = arith.cmpi sge, %110, %111 : vector<1x256xi32>
    %113 = arith.andi %108, %112 : vector<1x256xi1>
    %c-1_i32_51 = arith.constant -1 : i32
    %114 = vector.broadcast %c-1_i32_51 : i32 to vector<1x256xi32>
    %115 = arith.addi %4, %114 : vector<1x256xi32>
    %c16_i32_52 = arith.constant 16 : i32
    %116 = vector.broadcast %c16_i32_52 : i32 to vector<1x256xi32>
    %117 = arith.cmpi slt, %115, %116 : vector<1x256xi32>
    %118 = arith.andi %113, %117 : vector<1x256xi1>
    %c1_i32_53 = arith.constant 1 : i32
    %119 = vector.broadcast %c1_i32_53 : i32 to vector<1x256xi32>
    %120 = arith.addi %3, %119 : vector<1x256xi32>
    %c0_i32_54 = arith.constant 0 : i32
    %121 = vector.broadcast %c0_i32_54 : i32 to vector<1x256xi32>
    %122 = arith.cmpi sge, %120, %121 : vector<1x256xi32>
    %c1_i32_55 = arith.constant 1 : i32
    %123 = vector.broadcast %c1_i32_55 : i32 to vector<1x256xi32>
    %124 = arith.addi %3, %123 : vector<1x256xi32>
    %c16_i32_56 = arith.constant 16 : i32
    %125 = vector.broadcast %c16_i32_56 : i32 to vector<1x256xi32>
    %126 = arith.cmpi slt, %124, %125 : vector<1x256xi32>
    %127 = arith.andi %122, %126 : vector<1x256xi1>
    %c0_i32_57 = arith.constant 0 : i32
    %128 = vector.broadcast %c0_i32_57 : i32 to vector<1x256xi32>
    %129 = arith.addi %4, %128 : vector<1x256xi32>
    %c0_i32_58 = arith.constant 0 : i32
    %130 = vector.broadcast %c0_i32_58 : i32 to vector<1x256xi32>
    %131 = arith.cmpi sge, %129, %130 : vector<1x256xi32>
    %132 = arith.andi %127, %131 : vector<1x256xi1>
    %c0_i32_59 = arith.constant 0 : i32
    %133 = vector.broadcast %c0_i32_59 : i32 to vector<1x256xi32>
    %134 = arith.addi %4, %133 : vector<1x256xi32>
    %c16_i32_60 = arith.constant 16 : i32
    %135 = vector.broadcast %c16_i32_60 : i32 to vector<1x256xi32>
    %136 = arith.cmpi slt, %134, %135 : vector<1x256xi32>
    %137 = arith.andi %132, %136 : vector<1x256xi1>
    %c1_i32_61 = arith.constant 1 : i32
    %138 = vector.broadcast %c1_i32_61 : i32 to vector<1x256xi32>
    %139 = arith.addi %3, %138 : vector<1x256xi32>
    %c0_i32_62 = arith.constant 0 : i32
    %140 = vector.broadcast %c0_i32_62 : i32 to vector<1x256xi32>
    %141 = arith.cmpi sge, %139, %140 : vector<1x256xi32>
    %c1_i32_63 = arith.constant 1 : i32
    %142 = vector.broadcast %c1_i32_63 : i32 to vector<1x256xi32>
    %143 = arith.addi %3, %142 : vector<1x256xi32>
    %c16_i32_64 = arith.constant 16 : i32
    %144 = vector.broadcast %c16_i32_64 : i32 to vector<1x256xi32>
    %145 = arith.cmpi slt, %143, %144 : vector<1x256xi32>
    %146 = arith.andi %141, %145 : vector<1x256xi1>
    %c1_i32_65 = arith.constant 1 : i32
    %147 = vector.broadcast %c1_i32_65 : i32 to vector<1x256xi32>
    %148 = arith.addi %4, %147 : vector<1x256xi32>
    %c0_i32_66 = arith.constant 0 : i32
    %149 = vector.broadcast %c0_i32_66 : i32 to vector<1x256xi32>
    %150 = arith.cmpi sge, %148, %149 : vector<1x256xi32>
    %151 = arith.andi %146, %150 : vector<1x256xi1>
    %c1_i32_67 = arith.constant 1 : i32
    %152 = vector.broadcast %c1_i32_67 : i32 to vector<1x256xi32>
    %153 = arith.addi %4, %152 : vector<1x256xi32>
    %c16_i32_68 = arith.constant 16 : i32
    %154 = vector.broadcast %c16_i32_68 : i32 to vector<1x256xi32>
    %155 = arith.cmpi slt, %153, %154 : vector<1x256xi32>
    %156 = arith.andi %151, %155 : vector<1x256xi1>
    %cst = arith.constant dense<0.000000e+00> : vector<8xf32>
    %157 = vector.multi_reduction <add>, %0, %cst [1] : vector<8x256xf32> to vector<8xf32>
    %158 = vector.shape_cast %157 : vector<8xf32> to vector<8x1xf32>
    %159 = arith.mulf %0, %0 : vector<8x256xf32>
    %cst_69 = arith.constant dense<0.000000e+00> : vector<8xf32>
    %160 = vector.multi_reduction <add>, %159, %cst_69 [1] : vector<8x256xf32> to vector<8xf32>
    %161 = vector.shape_cast %160 : vector<8xf32> to vector<8x1xf32>
    %162 = tpu.concatenate %158, %161 in 1 : vector<8x1xf32>, vector<8x1xf32> -> vector<8x2xf32>
    %163 = vector.extract_strided_slice %162 {offsets = [0, 0], sizes = [4, 2], strides = [1, 1]} : vector<8x2xf32> to vector<4x2xf32>
    %164 = vector.extract_strided_slice %162 {offsets = [4, 0], sizes = [4, 2], strides = [1, 1]} : vector<8x2xf32> to vector<4x2xf32>
    %165 = arith.addf %163, %164 : vector<4x2xf32>
    %166 = tpu.concatenate %165, %165 in 0 : vector<4x2xf32>, vector<4x2xf32> -> vector<8x2xf32>
    %cst_70 = arith.constant 0.001953125 : f32
    %167 = vector.broadcast %cst_70 : f32 to vector<8x2xf32>
    %168 = arith.mulf %166, %167 : vector<8x2xf32>
    %169 = vector.extract_strided_slice %168 {offsets = [0, 0], sizes = [8, 1], strides = [1, 1]} : vector<8x2xf32> to vector<8x1xf32>
    %170 = vector.extract_strided_slice %168 {offsets = [0, 1], sizes = [8, 1], strides = [1, 1]} : vector<8x2xf32> to vector<8x1xf32>
    %171 = arith.mulf %169, %169 : vector<8x1xf32>
    %172 = arith.subf %170, %171 : vector<8x1xf32>
    %cst_71 = arith.constant 0.000000e+00 : f32
    %173 = vector.broadcast %cst_71 : f32 to vector<8x1xf32>
    %174 = arith.maximumf %172, %173 : vector<8x1xf32>
    %cst_72 = arith.constant 9.99999974E-6 : f32
    %175 = vector.broadcast %cst_72 : f32 to vector<8x1xf32>
    %176 = arith.addf %174, %175 : vector<8x1xf32>
    %177 = math.rsqrt %176 : vector<8x1xf32>
    %178 = arith.mulf %1, %177 : vector<8x1xf32>
    %179 = arith.mulf %169, %178 : vector<8x1xf32>
    %180 = arith.subf %2, %179 : vector<8x1xf32>
    %181 = vector.broadcast %178 : vector<8x1xf32> to vector<8x256xf32>
    %182 = arith.mulf %0, %181 : vector<8x256xf32>
    %183 = vector.broadcast %180 : vector<8x1xf32> to vector<8x256xf32>
    %184 = arith.addf %182, %183 : vector<8x256xf32>
    %cst_73 = arith.constant 0.000000e+00 : f32
    %185 = vector.broadcast %cst_73 : f32 to vector<8x256xf32>
    %186 = arith.maximumf %184, %185 : vector<8x256xf32>
    %c0_74 = arith.constant 0 : index
    %c0_75 = arith.constant 0 : index
    %187 = vector.load %arg5[%c0_74, %c0_75] : memref<8x128xf32, #tpu.memory_space<vmem>>, vector<8x128xf32>
    %c0_76 = arith.constant 0 : index
    %c0_77 = arith.constant 0 : index
    %188 = vector.load %arg6[%c0_76, %c0_77] : memref<8x1xf32, #tpu.memory_space<vmem>>, vector<8x1xf32>
    %c17_i32 = arith.constant 17 : i32
    %189 = tpu.dynamic_rotate %186 by %c17_i32 dim 1 : vector<8x256xf32>, i32 -> vector<8x256xf32>
    %cst_78 = arith.constant 0.000000e+00 : f32
    %190 = vector.shape_cast %23 : vector<1x256xi1> to vector<1x256xi1>
    %191 = vector.broadcast %190 : vector<1x256xi1> to vector<8x256xi1>
    %192 = vector.broadcast %cst_78 : f32 to vector<8x256xf32>
    %193 = arith.select %191, %189, %192 : vector<8x256xi1>, vector<8x256xf32>
    %c16_i32_79 = arith.constant 16 : i32
    %194 = tpu.dynamic_rotate %186 by %c16_i32_79 dim 1 : vector<8x256xf32>, i32 -> vector<8x256xf32>
    %cst_80 = arith.constant 0.000000e+00 : f32
    %195 = vector.shape_cast %42 : vector<1x256xi1> to vector<1x256xi1>
    %196 = vector.broadcast %195 : vector<1x256xi1> to vector<8x256xi1>
    %197 = vector.broadcast %cst_80 : f32 to vector<8x256xf32>
    %198 = arith.select %196, %194, %197 : vector<8x256xi1>, vector<8x256xf32>
    %c15_i32 = arith.constant 15 : i32
    %199 = tpu.dynamic_rotate %186 by %c15_i32 dim 1 : vector<8x256xf32>, i32 -> vector<8x256xf32>
    %cst_81 = arith.constant 0.000000e+00 : f32
    %200 = vector.shape_cast %61 : vector<1x256xi1> to vector<1x256xi1>
    %201 = vector.broadcast %200 : vector<1x256xi1> to vector<8x256xi1>
    %202 = vector.broadcast %cst_81 : f32 to vector<8x256xf32>
    %203 = arith.select %201, %199, %202 : vector<8x256xi1>, vector<8x256xf32>
    %c1_i32_82 = arith.constant 1 : i32
    %204 = tpu.dynamic_rotate %186 by %c1_i32_82 dim 1 : vector<8x256xf32>, i32 -> vector<8x256xf32>
    %cst_83 = arith.constant 0.000000e+00 : f32
    %205 = vector.shape_cast %80 : vector<1x256xi1> to vector<1x256xi1>
    %206 = vector.broadcast %205 : vector<1x256xi1> to vector<8x256xi1>
    %207 = vector.broadcast %cst_83 : f32 to vector<8x256xf32>
    %208 = arith.select %206, %204, %207 : vector<8x256xi1>, vector<8x256xf32>
    %c255_i32 = arith.constant 255 : i32
    %209 = tpu.dynamic_rotate %186 by %c255_i32 dim 1 : vector<8x256xf32>, i32 -> vector<8x256xf32>
    %cst_84 = arith.constant 0.000000e+00 : f32
    %210 = vector.shape_cast %99 : vector<1x256xi1> to vector<1x256xi1>
    %211 = vector.broadcast %210 : vector<1x256xi1> to vector<8x256xi1>
    %212 = vector.broadcast %cst_84 : f32 to vector<8x256xf32>
    %213 = arith.select %211, %209, %212 : vector<8x256xi1>, vector<8x256xf32>
    %c241_i32 = arith.constant 241 : i32
    %214 = tpu.dynamic_rotate %186 by %c241_i32 dim 1 : vector<8x256xf32>, i32 -> vector<8x256xf32>
    %cst_85 = arith.constant 0.000000e+00 : f32
    %215 = vector.shape_cast %118 : vector<1x256xi1> to vector<1x256xi1>
    %216 = vector.broadcast %215 : vector<1x256xi1> to vector<8x256xi1>
    %217 = vector.broadcast %cst_85 : f32 to vector<8x256xf32>
    %218 = arith.select %216, %214, %217 : vector<8x256xi1>, vector<8x256xf32>
    %c240_i32 = arith.constant 240 : i32
    %219 = tpu.dynamic_rotate %186 by %c240_i32 dim 1 : vector<8x256xf32>, i32 -> vector<8x256xf32>
    %cst_86 = arith.constant 0.000000e+00 : f32
    %220 = vector.shape_cast %137 : vector<1x256xi1> to vector<1x256xi1>
    %221 = vector.broadcast %220 : vector<1x256xi1> to vector<8x256xi1>
    %222 = vector.broadcast %cst_86 : f32 to vector<8x256xf32>
    %223 = arith.select %221, %219, %222 : vector<8x256xi1>, vector<8x256xf32>
    %c239_i32 = arith.constant 239 : i32
    %224 = tpu.dynamic_rotate %186 by %c239_i32 dim 1 : vector<8x256xf32>, i32 -> vector<8x256xf32>
    %cst_87 = arith.constant 0.000000e+00 : f32
    %225 = vector.shape_cast %156 : vector<1x256xi1> to vector<1x256xi1>
    %226 = vector.broadcast %225 : vector<1x256xi1> to vector<8x256xi1>
    %227 = vector.broadcast %cst_87 : f32 to vector<8x256xf32>
    %228 = arith.select %226, %224, %227 : vector<8x256xi1>, vector<8x256xf32>
    %cst_88 = arith.constant 0.000000e+00 : f32
    %229 = vector.broadcast %cst_88 : f32 to vector<56x256xf32>
    %230 = tpu.concatenate %193, %198, %203, %208, %186, %213, %218, %223, %228, %229 in 0 : vector<8x256xf32>, vector<8x256xf32>, vector<8x256xf32>, vector<8x256xf32>, vector<8x256xf32>, vector<8x256xf32>, vector<8x256xf32>, vector<8x256xf32>, vector<8x256xf32>, vector<56x256xf32> -> vector<128x256xf32>
    %cst_89 = arith.constant dense<0.000000e+00> : vector<8x256xf32>
    %231 = tpu.matmul %187, %230, %cst_89 {dimension_numbers = #tpu.dot_dimension_numbers<[1], [0], [0], [1], [0, 0, 1, 1], [], []>, precision = #tpu.contract_precision<fp32>} : vector<8x128xf32>, vector<128x256xf32>, vector<8x256xf32> -> vector<8x256xf32>
    %232 = vector.broadcast %188 : vector<8x1xf32> to vector<8x256xf32>
    %233 = arith.addf %231, %232 : vector<8x256xf32>
    %cst_90 = arith.constant dense<0.000000e+00> : vector<8xf32>
    %234 = vector.multi_reduction <add>, %233, %cst_90 [1] : vector<8x256xf32> to vector<8xf32>
    %235 = vector.shape_cast %234 : vector<8xf32> to vector<8x1xf32>
    %236 = arith.mulf %233, %233 : vector<8x256xf32>
    %cst_91 = arith.constant dense<0.000000e+00> : vector<8xf32>
    %237 = vector.multi_reduction <add>, %236, %cst_91 [1] : vector<8x256xf32> to vector<8xf32>
    %238 = vector.shape_cast %237 : vector<8xf32> to vector<8x1xf32>
    %239 = tpu.concatenate %235, %238 in 1 : vector<8x1xf32>, vector<8x1xf32> -> vector<8x2xf32>
    %240 = vector.extract_strided_slice %239 {offsets = [0, 0], sizes = [4, 2], strides = [1, 1]} : vector<8x2xf32> to vector<4x2xf32>
    %241 = vector.extract_strided_slice %239 {offsets = [4, 0], sizes = [4, 2], strides = [1, 1]} : vector<8x2xf32> to vector<4x2xf32>
    %242 = arith.addf %240, %241 : vector<4x2xf32>
    %243 = tpu.concatenate %242, %242 in 0 : vector<4x2xf32>, vector<4x2xf32> -> vector<8x2xf32>
    %cst_92 = arith.constant 0.001953125 : f32
    %244 = vector.broadcast %cst_92 : f32 to vector<8x2xf32>
    %245 = arith.mulf %243, %244 : vector<8x2xf32>
    %246 = vector.extract_strided_slice %245 {offsets = [0, 0], sizes = [8, 1], strides = [1, 1]} : vector<8x2xf32> to vector<8x1xf32>
    %247 = vector.extract_strided_slice %245 {offsets = [0, 1], sizes = [8, 1], strides = [1, 1]} : vector<8x2xf32> to vector<8x1xf32>
    %248 = arith.mulf %246, %246 : vector<8x1xf32>
    %249 = arith.subf %247, %248 : vector<8x1xf32>
    %cst_93 = arith.constant 0.000000e+00 : f32
    %250 = vector.broadcast %cst_93 : f32 to vector<8x1xf32>
    %251 = arith.maximumf %249, %250 : vector<8x1xf32>
    %cst_94 = arith.constant 9.99999974E-6 : f32
    %252 = vector.broadcast %cst_94 : f32 to vector<8x1xf32>
    %253 = arith.addf %251, %252 : vector<8x1xf32>
    %254 = math.rsqrt %253 : vector<8x1xf32>
    %255 = arith.mulf %1, %254 : vector<8x1xf32>
    %256 = arith.mulf %246, %255 : vector<8x1xf32>
    %257 = arith.subf %2, %256 : vector<8x1xf32>
    %258 = vector.broadcast %255 : vector<8x1xf32> to vector<8x256xf32>
    %259 = arith.mulf %233, %258 : vector<8x256xf32>
    %260 = vector.broadcast %257 : vector<8x1xf32> to vector<8x256xf32>
    %261 = arith.addf %259, %260 : vector<8x256xf32>
    %cst_95 = arith.constant 0.000000e+00 : f32
    %262 = vector.broadcast %cst_95 : f32 to vector<8x256xf32>
    %263 = arith.maximumf %261, %262 : vector<8x256xf32>
    %c0_96 = arith.constant 0 : index
    %c0_97 = arith.constant 0 : index
    %264 = vector.load %arg7[%c0_96, %c0_97] : memref<8x128xf32, #tpu.memory_space<vmem>>, vector<8x128xf32>
    %c0_98 = arith.constant 0 : index
    %c0_99 = arith.constant 0 : index
    %265 = vector.load %arg8[%c0_98, %c0_99] : memref<8x1xf32, #tpu.memory_space<vmem>>, vector<8x1xf32>
    %c17_i32_100 = arith.constant 17 : i32
    %266 = tpu.dynamic_rotate %263 by %c17_i32_100 dim 1 : vector<8x256xf32>, i32 -> vector<8x256xf32>
    %cst_101 = arith.constant 0.000000e+00 : f32
    %267 = vector.shape_cast %23 : vector<1x256xi1> to vector<1x256xi1>
    %268 = vector.broadcast %267 : vector<1x256xi1> to vector<8x256xi1>
    %269 = vector.broadcast %cst_101 : f32 to vector<8x256xf32>
    %270 = arith.select %268, %266, %269 : vector<8x256xi1>, vector<8x256xf32>
    %c16_i32_102 = arith.constant 16 : i32
    %271 = tpu.dynamic_rotate %263 by %c16_i32_102 dim 1 : vector<8x256xf32>, i32 -> vector<8x256xf32>
    %cst_103 = arith.constant 0.000000e+00 : f32
    %272 = vector.shape_cast %42 : vector<1x256xi1> to vector<1x256xi1>
    %273 = vector.broadcast %272 : vector<1x256xi1> to vector<8x256xi1>
    %274 = vector.broadcast %cst_103 : f32 to vector<8x256xf32>
    %275 = arith.select %273, %271, %274 : vector<8x256xi1>, vector<8x256xf32>
    %c15_i32_104 = arith.constant 15 : i32
    %276 = tpu.dynamic_rotate %263 by %c15_i32_104 dim 1 : vector<8x256xf32>, i32 -> vector<8x256xf32>
    %cst_105 = arith.constant 0.000000e+00 : f32
    %277 = vector.shape_cast %61 : vector<1x256xi1> to vector<1x256xi1>
    %278 = vector.broadcast %277 : vector<1x256xi1> to vector<8x256xi1>
    %279 = vector.broadcast %cst_105 : f32 to vector<8x256xf32>
    %280 = arith.select %278, %276, %279 : vector<8x256xi1>, vector<8x256xf32>
    %c1_i32_106 = arith.constant 1 : i32
    %281 = tpu.dynamic_rotate %263 by %c1_i32_106 dim 1 : vector<8x256xf32>, i32 -> vector<8x256xf32>
    %cst_107 = arith.constant 0.000000e+00 : f32
    %282 = vector.shape_cast %80 : vector<1x256xi1> to vector<1x256xi1>
    %283 = vector.broadcast %282 : vector<1x256xi1> to vector<8x256xi1>
    %284 = vector.broadcast %cst_107 : f32 to vector<8x256xf32>
    %285 = arith.select %283, %281, %284 : vector<8x256xi1>, vector<8x256xf32>
    %c255_i32_108 = arith.constant 255 : i32
    %286 = tpu.dynamic_rotate %263 by %c255_i32_108 dim 1 : vector<8x256xf32>, i32 -> vector<8x256xf32>
    %cst_109 = arith.constant 0.000000e+00 : f32
    %287 = vector.shape_cast %99 : vector<1x256xi1> to vector<1x256xi1>
    %288 = vector.broadcast %287 : vector<1x256xi1> to vector<8x256xi1>
    %289 = vector.broadcast %cst_109 : f32 to vector<8x256xf32>
    %290 = arith.select %288, %286, %289 : vector<8x256xi1>, vector<8x256xf32>
    %c241_i32_110 = arith.constant 241 : i32
    %291 = tpu.dynamic_rotate %263 by %c241_i32_110 dim 1 : vector<8x256xf32>, i32 -> vector<8x256xf32>
    %cst_111 = arith.constant 0.000000e+00 : f32
    %292 = vector.shape_cast %118 : vector<1x256xi1> to vector<1x256xi1>
    %293 = vector.broadcast %292 : vector<1x256xi1> to vector<8x256xi1>
    %294 = vector.broadcast %cst_111 : f32 to vector<8x256xf32>
    %295 = arith.select %293, %291, %294 : vector<8x256xi1>, vector<8x256xf32>
    %c240_i32_112 = arith.constant 240 : i32
    %296 = tpu.dynamic_rotate %263 by %c240_i32_112 dim 1 : vector<8x256xf32>, i32 -> vector<8x256xf32>
    %cst_113 = arith.constant 0.000000e+00 : f32
    %297 = vector.shape_cast %137 : vector<1x256xi1> to vector<1x256xi1>
    %298 = vector.broadcast %297 : vector<1x256xi1> to vector<8x256xi1>
    %299 = vector.broadcast %cst_113 : f32 to vector<8x256xf32>
    %300 = arith.select %298, %296, %299 : vector<8x256xi1>, vector<8x256xf32>
    %c239_i32_114 = arith.constant 239 : i32
    %301 = tpu.dynamic_rotate %263 by %c239_i32_114 dim 1 : vector<8x256xf32>, i32 -> vector<8x256xf32>
    %cst_115 = arith.constant 0.000000e+00 : f32
    %302 = vector.shape_cast %156 : vector<1x256xi1> to vector<1x256xi1>
    %303 = vector.broadcast %302 : vector<1x256xi1> to vector<8x256xi1>
    %304 = vector.broadcast %cst_115 : f32 to vector<8x256xf32>
    %305 = arith.select %303, %301, %304 : vector<8x256xi1>, vector<8x256xf32>
    %cst_116 = arith.constant 0.000000e+00 : f32
    %306 = vector.broadcast %cst_116 : f32 to vector<56x256xf32>
    %307 = tpu.concatenate %270, %275, %280, %285, %263, %290, %295, %300, %305, %306 in 0 : vector<8x256xf32>, vector<8x256xf32>, vector<8x256xf32>, vector<8x256xf32>, vector<8x256xf32>, vector<8x256xf32>, vector<8x256xf32>, vector<8x256xf32>, vector<8x256xf32>, vector<56x256xf32> -> vector<128x256xf32>
    %cst_117 = arith.constant dense<0.000000e+00> : vector<8x256xf32>
    %308 = tpu.matmul %264, %307, %cst_117 {dimension_numbers = #tpu.dot_dimension_numbers<[1], [0], [0], [1], [0, 0, 1, 1], [], []>, precision = #tpu.contract_precision<fp32>} : vector<8x128xf32>, vector<128x256xf32>, vector<8x256xf32> -> vector<8x256xf32>
    %309 = vector.broadcast %265 : vector<8x1xf32> to vector<8x256xf32>
    %310 = arith.addf %308, %309 : vector<8x256xf32>
    %311 = arith.addf %0, %310 : vector<8x256xf32>
    %c0_118 = arith.constant 0 : index
    %c0_119 = arith.constant 0 : index
    %312 = vector.load %arg9[%c0_118, %c0_119] : memref<8x256xf32, #tpu.memory_space<vmem>>, vector<8x256xf32>
    tpu.vector_store %arg9[%c0_118, %c0_119], %311 {strides = array<i32>} : memref<8x256xf32, #tpu.memory_space<vmem>>, vector<8x256xf32>,
    return
  }
}

</mosaic_0001>

<bundles_post_ra>
// kernel: tpu_custom_call.1
= control target key start
LH: loop header
LB: loop body
LE: loop exit
PB: predicated region body
PF: predicated region fallthrough
CT: control target
= control target key end

     0   :  { %s3088_s0 = inlined_call_operand.vmem [shape: f32[8,256], index: 0, kind: input, shape index: {}]   ;;  %s3089_s1 = inlined_call_operand.vmem [shape: s32[1,256], index: 1, kind: input, shape index: {}]   ;;  %s3090_s2 = inlined_call_operand.vmem [shape: s32[1,256], index: 2, kind: input, shape index: {}]   ;;  %s3091_s3 = inlined_call_operand.vmem [shape: f32[8,1], index: 3, kind: input, shape index: {}]   ;;  %s3092_s4 = inlined_call_operand.vmem [shape: f32[8,1], index: 4, kind: input, shape index: {}]   ;;  %s3093_s5 = inlined_call_operand.vmem [shape: f32[8,128], index: 5, kind: input, shape index: {}]   ;;  %s3094_s6 = inlined_call_operand.vmem [shape: f32[8,1], index: 6, kind: input, shape index: {}]   ;;  %s3095_s7 = inlined_call_operand.vmem [shape: f32[8,128], index: 7, kind: input, shape index: {}]   ;;  %s3096_s8 = inlined_call_operand.vmem [shape: f32[8,1], index: 8, kind: input, shape index: {}]   ;;  %s3097_s9 = inlined_call_operand.hbm [shape: f32[8,256], index: 9, kind: output, shape index: {}]  }
   0x1   :  { %v33_v0 = vld [vmem:[%s3088_s0] sm:$0xff]  ;;  %v34_v1 = vld [vmem:[%s3088_s0 + $0x8] sm:$0xff] }
   0x2   :  { %14 = vsyncpa [#allocation3], 0  ;;  %v74_v2 = vadd.f32 %v34_v1, %v33_v0  ;;  %v77_v3 = vmul.f32 %v33_v0, %v33_v0  ;;  %v78_v4 = vmul.f32 %v34_v1, %v34_v1  ;;  %vm3100_vm0 = vcmask 7168   ;;  %s2039_s13 = smov 1   ;;  %s2041_s14 = smov 127   ;;  %v2115_v21 = vld [vmem:[%s3091_s3] sm:$0xff] }
   0x3   :  { %vm3098_vm1 = vcmask 1043456   ;;  %v2040_v19 = vmov 0   ;;  %v2121_v24 = vld [vmem:[%s3092_s4] sm:$0xff]  ;;  %s2042_s3 = smov 113   ;;  %s2043_s19 = smov 17   ;;  %v3115_v36 = vmov 0.0   ;;  %v132_v42 = vlaneseq }
   0x4   :  { %75 = vadd.xlane.f32.xlu0 %v74_v2  ;;  %v79_v5 = vadd.f32 %v78_v4, %v77_v3  ;;  %2008 = vset.pattern.permute.xlu1 %v2040_v19  ;;  %s2044_s4 = smov 112   ;;  %s2045_s20 = smov 111   ;;  %v127_v35 = vld [vmem:[%s3094_s6] sm:$0xff] }
   0x5   :  { %2007 = vset.pattern.permute.xlu0 %v2040_v19  ;;  %s2046_s21 = smov 16   ;;  %s2047_s24 = smov 15   ;;  %377 = vmatprep.mubr.f32.mxu0 %v3115_v36  ;;  %v37_v37 = vld [vmem:[%s3089_s1] sm:$0x3]  ;;  %v139_v43 = vshrl.u32 %v132_v42, 7  ;;  %v2201_v48 = vand.u32 127, %v132_v42 }
   0x6   :  { %1171 = vmatprep.mubr.f32.mxu1 %v3115_v36  ;;  %v2171_v38 = vld [vmem:[%s3090_s2] sm:$0x3]  ;;  %v39_v39 = vadd.s32 4294967295, %v37_v37  ;;  %vm57_vm15 = vcmp.ge.s32.totalorder %v37_v37, 0 }
   0x7   :  { %v2174_v40 = vadd.s32 4294967295, %v2171_v38  ;;  %vm48_vm8 = vcmp.ge.s32.totalorder %v2171_v38, 0  ;;  %vm3102_vm11 = vcmp.lt.s32.totalorder %v2171_v38, 16  ;;  %v2194_v45 = vsub.s32 0, %v139_v43  ;;  %v1018_v58 = vld [vmem:[%s3095_s7] sm:$0xff]  ;;  %s2049_s7 = smov [#allocation2]  }
   0x8   :  { %80 = vadd.xlane.f32.xlu0 %v79_v5  ;;  %vm40_vm2 = vcmp.ge.s32.totalorder %v39_v39, 0  ;;  %vm41_vm3 = vcmp.lt.s32.totalorder %v39_v39, 16  ;;  %v2197_v47 = vsub.s32 1, %v139_v43  ;;  %v2207_v53 = vadd.s32 1, %v2171_v38  ;;  %s1772_s30 = sshll.u32 %s2049_s7, 4  ;;  %s1773_s30 = int_to_ptr.vmem [resolvable:$true] %s1772_s30 }
   0x9   :  { %vm2176_vm4 = vmand %vm40_vm2, %vm41_vm3  ;;  %vm44_vm5 = vcmp.ge.s32.totalorder %v2174_v40, 0  ;;  %vm46_vm7 = vcmp.lt.s32.totalorder %v2174_v40, 16  ;;  %vm3099_vm13 = vcmp.lt.s32.totalorder %v2201_v48, 17  ;;  %vm58_vm2 = vcmp.lt.s32.totalorder %v37_v37, 16  ;;  %p2020_p1 = scmp.lt.s32.totalorder %s1773_s30, %s1773_s30 }
   0xa   :  { %vm45_vm6 = vmand %vm2176_vm4, %vm44_vm5  ;;  %v64_v5 = vadd.s32 1, %v37_v37 }
   0xb   :  { %vm47_vm9 = vmand %vm45_vm6, %vm46_vm7  ;;  %vm3104_vm6 = vcmp.ge.s32.totalorder %v2207_v53, 0 }
   0xc   :  { %vm49_vm10 = vmand %vm2176_vm4, %vm48_vm8  ;;  %v137_v46 = vsel %vm47_vm9, 1, %v2040_v19  ;;  %vm3101_vm9 = vcmp.lt.s32.totalorder %v2201_v48, 16 }
   0xd   :  { %vm51_vm12 = vmand %vm49_vm10, %vm3102_vm11  ;;  %v141_v49 = vrot.slane %v137_v46, %v2194_v45  ;;  %v145_v52 = vrot.slane %v137_v46, %v2197_v47  ;;  %vm66_vm11 = vcmp.lt.s32.totalorder %v64_v5, 16 }
   0xe   :  { %v157_v51 = vsel %vm51_vm12, 1, %v2040_v19 }
   0xf   :  { %v161_v54 = vrot.slane %v157_v51, %v2194_v45  ;;  %v165_v55 = vrot.slane %v157_v51, %v2197_v47  ;;  %vm2212_vm14 = vcmp.eq.s32.totalorder %v141_v49, 1  ;;  %vm2216_vm3 = vcmp.eq.s32.totalorder %v145_v52, 1  ;;  %v126_v52 = vld [vmem:[%s3093_s5] sm:$0xff] }
  0x11   :  { %vm2226_vm10 = vcmp.eq.s32.totalorder %v161_v54, 1  ;;  %vm2230_vm12 = vcmp.eq.s32.totalorder %v165_v55, 1 }
  0x91   :  { %v76_v6 = vpop.xlane.xlu0 %75 }
  0x95   :  { %v81_v7 = vpop.xlane.xlu0 %80 }
  0x96   :  { %v83_v8 = vsel %vm3100_vm0, %v76_v6, %v81_v7  ;;  %vm3103_vm0 = vcmp.lt.s32.totalorder %v2207_v53, 16 }
  0x97   :  { %v85_v9 = vrot.slane %v83_v8, 4 }
  0x99   :  { %v87_v10 = vadd.f32 %v85_v9, %v83_v8 }
  0x9b   :  { %v89_v11 = vrot.slane %v87_v10, 4 }
  0x9d   :  { %v92_v12 = vsel %vm3098_vm1, %v87_v10, %v89_v11  ;;  %vm2234_vm1 = vmand %vm57_vm15, %vm58_vm2 }
  0x9e   :  { %v93_v13 = vmul.f32 0.001953125, %v92_v12 }
  0xa0   :  { %v94_v14 = vmul.f32 %v93_v13, %v93_v13 }
  0xa2   :  { %96 = vrot.lane.b32.xlu1 %v94_v14, %s2039_s13 }
 0x114   :  { %v97_v15 = vpop.permute.xlu1 %96 }
 0x115   :  { %v99_v16 = vsub.f32 %v93_v13, %v97_v15 }
 0x117   :  { %v100_v17 = vmax.f32 %v99_v16, 0.0 }
 0x119   :  { %v101_v18 = vadd.f32 1e-05, %v100_v17 }
 0x11b   :  { %2009 = vrsqrt.f32 %v101_v18 }
 0x125   :  { %v2010_v20 = vpop.eup %2009 }
 0x126   :  { %104 = vrot.lane.b32.xlu1 %v2010_v20, %s2041_s14 }
 0x198   :  { %v105_v22 = vpop.permute.xlu1 %104 }
 0x199   :  { %v107_v23 = vmul.f32 %v105_v22, %v2115_v21 }
 0x19b   :  { %v108_v25 = vmul.f32 %v107_v23, %v93_v13  ;;  %112 = vperm.xlu0 %2007, %v107_v23  }
 0x19d   :  { %v109_v26 = vsub.f32 %v2121_v24, %v108_v25 }
 0x19f   :  { %119 = vperm.xlu1 %2008, %v109_v26  }
 0x21a   :  { %v113_v27 = vpop.permute.xlu0 %112 }
 0x21b   :  { %v115_v28 = vmul.f32 %v113_v27, %v33_v0  ;;  %v116_v30 = vmul.f32 %v113_v27, %v34_v1 }
 0x21e   :  { %v120_v29 = vpop.permute.xlu1 %119 }
 0x21f   :  { %v122_v31 = vadd.f32 %v120_v29, %v115_v28  ;;  %v123_v32 = vadd.f32 %v120_v29, %v116_v30 }
 0x221   :  { %v2124_v33 = vmax.f32 %v122_v31, 0.0  ;;  %v2130_v34 = vmax.f32 %v123_v32, 0.0 }
 0x223   :  { %230 = vrot.lane.b32.xlu0 %v2124_v33, %s2042_s3  ;;  %128 = vrot.lane.b32.xlu1 %v2124_v33, %s2043_s19  ;;  %v311_v27 = vand.u32 4294901760, %v2130_v34  ;;  %v313_v28 = vand.u32 4294901760, %v2124_v33 }
 0x225   :  { %v2365_v51 = vsub.f32 %v2124_v33, %v313_v28 }
 0x227   :  { %250 = vrot.lane.b32.xlu0 %v2124_v33, %s2044_s4  ;;  %130 = vrot.lane.b32.xlu1 %v2130_v34, %s2043_s19 }
 0x22b   :  { %270 = vrot.lane.b32.xlu0 %v2124_v33, %s2045_s20  ;;  %150 = vrot.lane.b32.xlu1 %v2124_v33, %s2046_s21 }
 0x22f   :  { %292 = vperm.xlu0 %2007, %v127_v35   ;;  %152 = vrot.lane.b32.xlu1 %v2130_v34, %s2046_s21 }
 0x233   :  { %170 = vrot.lane.b32.xlu1 %v2124_v33, %s2047_s24 }
 0x237   :  { %172 = vrot.lane.b32.xlu1 %v2130_v34, %s2047_s24 }
 0x23b   :  { %190 = vrot.lane.b32.xlu1 %v2124_v33, %s2039_s13 }
 0x23f   :  { %192 = vrot.lane.b32.xlu1 %v2130_v34, %s2039_s13 }
 0x243   :  { %210 = vrot.lane.b32.xlu1 %v2124_v33, %s2041_s14 }
 0x247   :  { %212 = vrot.lane.b32.xlu1 %v2130_v34, %s2041_s14 }
 0x24b   :  { %232 = vrot.lane.b32.xlu1 %v2130_v34, %s2042_s3 }
 0x24f   :  { %252 = vrot.lane.b32.xlu1 %v2130_v34, %s2044_s4 }
 0x253   :  { %272 = vrot.lane.b32.xlu1 %v2130_v34, %s2045_s20 }
 0x295   :  { %v129_v44 = vpop.permute.xlu1 %128 }
 0x299   :  { %v131_v50 = vpop.permute.xlu1 %130 }
 0x29a   :  { %v135_v59 = vsel %vm3099_vm13, %v129_v44, %v131_v50  ;;  %v136_v60 = vsel %vm3099_vm13, %v131_v50, %v129_v44  ;;  %vm54_vm13 = vmand %vm2176_vm4, %vm3104_vm6  ;;  %v2355_v44 = vsub.f32 %v2130_v34, %v311_v27 }
 0x29b   :  { %v2240_v0 = vsel %vm2212_vm14, %v136_v60, 0.0  ;;  %v2244_v1 = vsel %vm2216_vm3, %v135_v59, 0.0  ;;  %vm60_vm4 = vmand %vm2234_vm1, %vm44_vm5 }
 0x29c   :  { %v295_v8 = vand.u32 4294901760, %v2244_v1  ;;  %v297_v9 = vand.u32 4294901760, %v2240_v0  ;;  %vm56_vm15 = vmand %vm54_vm13, %vm3103_vm0 }
 0x29d   :  { %v151_v57 = vpop.permute.xlu1 %150  ;;  %vm61_vm2 = vmand %vm60_vm4, %vm46_vm7  ;;  %v177_v15 = vsel %vm56_vm15, 1, %v2040_v19  ;;  %vm3105_vm15 = vcmp.lt.s32.totalorder %v2201_v48, 15 }
 0x29e   :  { %v197_v17 = vsel %vm61_vm2, 1, %v2040_v19  ;;  %v181_v20 = vrot.slane %v177_v15, %v2194_v45  ;;  %v185_v22 = vrot.slane %v177_v15, %v2197_v47  ;;  %vm62_vm4 = vmand %vm2234_vm1, %vm3104_vm6  ;;  %v2428_v41 = vsub.f32 %v2244_v1, %v295_v8 }
 0x29f   :  { %v201_v23 = vrot.slane %v197_v17, %v2194_v45  ;;  %v205_v25 = vrot.slane %v197_v17, %v2197_v47 }
 0x2a0   :  { %vm2312_vm1 = vcmp.eq.s32.totalorder %v181_v20, 1  ;;  %vm2316_vm2 = vcmp.eq.s32.totalorder %v185_v22, 1  ;;  %v3164_v20 = vmov 0 }
 0x2a1   :  { %v153_v2 = vpop.permute.xlu1 %152  ;;  %vm2331_vm6 = vcmp.eq.s32.totalorder %v205_v25, 1  ;;  %v231_v25 = vpop.permute.xlu0 %230 }
 0x2a2   :  { %v155_v3 = vsel %vm3101_vm9, %v151_v57, %v153_v2  ;;  %v156_v4 = vsel %vm3101_vm9, %v153_v2, %v151_v57  ;;  %vm65_vm9 = vcmp.ge.s32.totalorder %v64_v5, 0 }
 0x2a3   :  { %v2257_v6 = vsel %vm2226_vm10, %v156_v4, 0.0  ;;  %v2261_v7 = vsel %vm2230_vm12, %v155_v3, 0.0  ;;  %vm2291_vm13 = vmand %vm65_vm9, %vm66_vm11 }
 0x2a4   :  { %v299_v10 = vand.u32 4294901760, %v2261_v7  ;;  %v301_v11 = vand.u32 4294901760, %v2257_v6  ;;  %vm68_vm11 = vmand %vm2291_vm13, %vm44_vm5  ;;  %vm3107_vm5 = vcmp.lt.s32.totalorder %v2201_v48, 1 }
 0x2a5   :  { %v171_v12 = vpop.permute.xlu1 %170  ;;  %vm63_vm9 = vmand %vm62_vm4, %vm3103_vm0  ;;  %vm2327_vm0 = vcmp.eq.s32.totalorder %v201_v23, 1 }
 0x2a6   :  { %v2277_v13 = vpack.c.bf16 %v299_v10, %v295_v8  ;;  %v2283_v14 = vpack.c.bf16 %v301_v11, %v297_v9  ;;  %vm69_vm4 = vmand %vm68_vm11, %vm46_vm7  ;;  %v217_v39 = vsel %vm63_vm9, 1, %v2040_v19  ;;  %vm3158_vm7 = vcmp.ge.s32.totalorder %v2207_v53, 0 }
 0x2a7   :  { %v237_v50 = vsel %vm69_vm4, 1, %v2040_v19  ;;  %v221_v57 = vrot.slane %v217_v39, %v2194_v45  ;;  %v225_v59 = vrot.slane %v217_v39, %v2197_v47  ;;  %vm3159_vm11 = vcmp.lt.s32.totalorder %v2171_v38, 16 }
 0x2a8   :  { %1781 = vmatprep.subr.bf16.mxu0 %v2277_v13  ;;  %v241_v5 = vrot.slane %v237_v50, %v2194_v45  ;;  %vm3160_vm9 = vcmp.lt.s32.totalorder %v2207_v53, 16  ;;  %v3161_v53 = vmov 0  ;;  %v245_v22 = vrot.slane %v237_v50, %v2197_v47 }
 0x2a9   :  { %1783 = vmatpush1.bf16.msra.mxu0 %v2283_v14  ;;  %v173_v16 = vpop.permute.xlu1 %172 }
 0x2aa   :  { %v175_v31 = vsel %vm3105_vm15, %v171_v12, %v173_v16  ;;  %v176_v32 = vsel %vm3105_vm15, %v173_v16, %v171_v12  ;;  %vm2340_vm15 = vmand %vm2291_vm13, %vm48_vm8  ;;  %v2392_v12 = vand.u32 4294901760, %v126_v52 }
 0x2ab   :  { %v2346_v40 = vsel %vm2312_vm1, %v176_v32, 0.0  ;;  %v2350_v42 = vsel %vm2316_vm2, %v175_v31, 0.0  ;;  %vm72_vm8 = vmand %vm2291_vm13, %vm3158_vm7  ;;  %vm2405_vm7 = vcmp.eq.s32.totalorder %v221_v57, 1  ;;  %v3167_v31 = vmov 0 }
 0x2ac   :  { %vm71_vm13 = vmand %vm2340_vm15, %vm3159_vm11  ;;  %v303_v60 = vand.u32 4294901760, %v2350_v42  ;;  %v305_v63 = vand.u32 4294901760, %v2346_v40  ;;  %vm3106_vm15 = vcmp.lt.s32.totalorder %v2201_v48, 127  ;;  %v3162_v53 = vsel %vm2405_vm7, 4294967295, %v3161_v53 }
 0x2ad   :  { %v191_v26 = vpop.permute.xlu1 %190  ;;  %vm73_vm4 = vmand %vm72_vm8, %vm3160_vm9  ;;  %v257_v16 = vsel %vm71_vm13, 1, %v2040_v19  ;;  %3163 = vst [vmem:[#allocation5_spill] sm:$0xff] %v3162_v53  ;;  %vm2409_vm8 = vcmp.eq.s32.totalorder %v225_v59, 1  ;;  %vm3110_vm11 = vcmp.lt.s32.totalorder %v2201_v48, 113  ;;  %vm2417_vm13 = vcmp.eq.s32.totalorder %v241_v5, 1 }
 0x2ae   :  { %v3165_v20 = vsel %vm2409_vm8, 4294967295, %v3164_v20  ;;  %v277_v23 = vsel %vm73_vm4, 1, %v2040_v19  ;;  %v3168_v31 = vsel %vm2417_vm13, 4294967295, %v3167_v31  ;;  %v261_v32 = vrot.slane %v257_v16, %v2194_v45 }
 0x2af   :  { %3166 = vst [vmem:[#allocation6_spill] sm:$0xff] %v3165_v20  ;;  %3169 = vst [vmem:[#allocation7_spill] sm:$0xff] %v3168_v31  ;;  %v2423_v39 = vsub.f32 %v126_v52, %v2392_v12  ;;  %v281_v8 = vrot.slane %v277_v23, %v2194_v45  ;;  %v2448_v52 = vsub.f32 %v2261_v7, %v299_v10  ;;  %vm2456_vm9 = vcmp.eq.s32.totalorder %v245_v22, 1 }
 0x2b0   :  { %v3113_v7 = vand.u32 4294901760, %v2428_v41  ;;  %v2496_v33 = vsub.f32 %v2350_v42, %v303_v60  ;;  %vm3185_vm4 = vcmp.lt.s32.totalorder %v2201_v48, 112 }
 0x2b1   :  { %v193_v43 = vpop.permute.xlu1 %192  ;;  %v3111_v45 = vand.u32 4294901760, %v2423_v39 }
 0x2b2   :  { %v195_v46 = vsel %vm3107_vm5, %v191_v26, %v193_v43  ;;  %v196_v49 = vsel %vm3107_vm5, %v193_v43, %v191_v26 }
 0x2b3   :  { %v2376_v54 = vsel %vm2327_vm0, %v196_v49, 0.0  ;;  %v209_v55 = vsel %vm2331_vm6, %v195_v46, 0.0  ;;  %v265_v46 = vrot.slane %v257_v16, %v2197_v47  ;;  %v2438_v49 = vsub.f32 %v2257_v6, %v301_v11 }
 0x2b4   :  { %v307_v2 = vand.u32 4294901760, %v209_v55  ;;  %v309_v3 = vand.u32 4294901760, %v2376_v54  ;;  %v2454_v6 = vsub.f32 %v2240_v0, %v297_v9  ;;  %v3170_v11 = vmov 0  ;;  %v251_v9 = vpop.permute.xlu0 %250 }
 0x2b5   :  { %v211_v4 = vpop.permute.xlu1 %210  ;;  %v3171_v11 = vsel %vm2456_vm9, 4294967295, %v3170_v11  ;;  %vm2469_vm5 = vcmp.eq.s32.totalorder %v265_v46, 1  ;;  %v3176_v0 = vmov 0  ;;  %v3112_v16 = vand.u32 4294901760, %v2438_v49 }
 0x2b6   :  { %v2394_v15 = vpack.c.bf16 %v307_v2, %v303_v60  ;;  %v2398_v38 = vpack.c.bf16 %v309_v3, %v305_v63  ;;  %3172 = vst [vmem:[#allocation8_spill] sm:$0xff] %v3171_v11  ;;  %v2463_v10 = vsub.f32 %v209_v55, %v307_v2  ;;  %v3177_v0 = vsel %vm2469_vm5, 4294967295, %v3176_v0 }
 0x2b7   :  { %3178 = vst [vmem:[#allocation10_spill] sm:$0xff] %v3177_v0  ;;  %v3114_v55 = vand.u32 4294901760, %v2448_v52  ;;  %v2508_v46 = vsub.f32 %v2376_v54, %v309_v3  ;;  %v392_v60 = vsub.f32 %v2428_v41, %v3113_v7  ;;  %v3189_v31 = vand.u32 4294901760, %v2454_v6 }
 0x2b8   :  { %1785 = vmatprep.subr.bf16.mxu0 %v2394_v15  ;;  %v271_v7 = vpop.permute.xlu0 %270 }
 0x2b9   :  { %1787 = vmatpush1.bf16.msra.mxu0 %v2398_v38  ;;  %v213_v26 = vpop.permute.xlu1 %212 }
 0x2ba   :  { %v215_v19 = vsel %vm3106_vm15, %v211_v4, %v213_v26  ;;  %v216_v43 = vsel %vm3106_vm15, %v213_v26, %v211_v4  ;;  %v285_v4 = vrot.slane %v277_v23, %v2197_v47  ;;  %vm2465_vm15 = vcmp.eq.s32.totalorder %v261_v32, 1 }
 0x2bb   :  { %v228_v50 = vsel %vm2405_vm7, %v215_v19, 0.0  ;;  %v229_v1 = vsel %vm2409_vm8, %v216_v43, 0.0  ;;  %v3173_v47 = vmov 0  ;;  %vm2486_vm8 = vcmp.eq.s32.totalorder %v281_v8, 1 }
 0x2bc   :  { %v315_v57 = vand.u32 4294901760, %v229_v1  ;;  %v317_v59 = vand.u32 4294901760, %v228_v50  ;;  %v3174_v47 = vsel %vm2465_vm15, 4294967295, %v3173_v47  ;;  %v3179_v26 = vmov 0 }
 0x2bd   :  { %v233_v5 = vpop.permute.xlu1 %232  ;;  %3175 = vst [vmem:[#allocation9_spill] sm:$0xff] %v3174_v47  ;;  %v3180_v26 = vsel %vm2486_vm8, 4294967295, %v3179_v26  ;;  %vm2490_vm7 = vcmp.eq.s32.totalorder %v285_v4, 1  ;;  %v3182_v32 = vmov 0  ;;  %v2504_v19 = vsub.f32 %v2423_v39, %v3111_v45 }
 0x2be   :  { %v2476_v22 = vpack.c.bf16 %v315_v57, %v311_v27  ;;  %v2480_v23 = vpack.c.bf16 %v317_v59, %v313_v28  ;;  %v236_v2 = vsel %vm3110_vm11, %v233_v5, %v231_v25  ;;  %3181 = vst [vmem:[#allocation11_spill] sm:$0xff] %v3180_v26  ;;  %v3183_v32 = vsel %vm2490_vm7, 4294967295, %v3182_v32 }
 0x2bf   :  { %3184 = vst [vmem:[#allocation12_spill] sm:$0xff] %v3183_v32  ;;  %v235_v27 = vsel %vm3110_vm11, %v231_v25, %v233_v5  ;;  %v3118_v43 = vand.u32 4294901760, %v2463_v10  ;;  %v410_v25 = vsub.f32 %v2438_v49, %v3112_v16  ;;  %v249_v8 = vsel %vm2456_vm9, %v236_v2, 0.0  ;;  %vm3186_vm11 = vmmov %vm3185_vm4 }
 0x2c0   :  { %1789 = vmatprep.subr.bf16.mxu0 %v2476_v22  ;;  %v2525_v4 = vsub.f32 %v229_v1, %v315_v57  ;;  %v248_v5 = vsel %vm2417_vm13, %v235_v27, 0.0  ;;  %v404_v16 = vsub.f32 %v2448_v52, %v3114_v55  ;;  %v2546_v36 = vsub.f32 %v228_v50, %v317_v59 }
 0x2c1   :  { %v253_v28 = vpop.permute.xlu1 %252  ;;  %1791 = vmatpush1.bf16.msra.mxu0 %v2480_v23  ;;  %v428_v55 = vsub.f32 %v2463_v10, %v3118_v43  ;;  %v321_v18 = vand.u32 4294901760, %v248_v5  ;;  %v398_v50 = vsub.f32 %v2454_v6, %v3189_v31  ;;  %v411_v32 = vand.u32 4294901760, %v410_v25 }
 0x2c2   :  { %v255_v42 = vsel %vm3185_vm4, %v251_v9, %v253_v28  ;;  %v256_v54 = vsel %vm3186_vm11, %v253_v28, %v251_v9  ;;  %v2538_v9 = vsub.f32 %v2346_v40, %v305_v63  ;;  %vm3187_vm11 = vcmp.lt.s32.totalorder %v2201_v48, 111 }
 0x2c3   :  { %v268_v3 = vsel %vm2465_vm15, %v255_v42, 0.0  ;;  %v269_v45 = vsel %vm2469_vm5, %v256_v54, 0.0  ;;  %v319_v42 = vand.u32 4294901760, %v249_v8  ;;  %vm3188_vm4 = vmmov %vm3187_vm11  ;;  %v3191_v31 = vand.u32 4294901760, %v2508_v46 }
 0x2c4   :  { %v323_v1 = vand.u32 4294901760, %v269_v45  ;;  %v325_v57 = vand.u32 4294901760, %v268_v3  ;;  %v3193_v26 = vand.u32 4294901760, %v2538_v9  ;;  %v2589_v0 = vsub.f32 %v248_v5, %v321_v18 }
 0x2c5   :  { %v273_v28 = vpop.permute.xlu1 %272  ;;  %v434_v59 = vsub.f32 %v2508_v46, %v3191_v31 }
 0x2c6   :  { %v276_v54 = vsel %vm3187_vm11, %v273_v28, %v271_v7  ;;  %v275_v40 = vsel %vm3188_vm4, %v271_v7, %v273_v28  ;;  %v2553_v27 = vsub.f32 %v269_v45, %v323_v1  ;;  %v2557_v34 = vpack.c.bf16 %v323_v1, %v319_v42 }
 0x2c7   :  { %v289_v63 = vsel %vm2490_vm7, %v276_v54, 0.0  ;;  %v2563_v43 = vpack.c.bf16 %v325_v57, %v321_v18  ;;  %v382_v7 = vand.u32 4294901760, %v2504_v19  ;;  %v2566_v28 = vsub.f32 %v249_v8, %v319_v42 }
 0x2c8   :  { %v2555_v2 = vand.u32 4294901760, %v289_v63  ;;  %v288_v45 = vsel %vm2486_vm8, %v275_v40, 0.0  ;;  %1793 = vmatprep.subr.bf16.mxu0 %v2557_v34  ;;  %v405_v54 = vand.u32 4294901760, %v404_v16  ;;  %v3190_v1 = vand.u32 4294901760, %v2496_v33 }
 0x2c9   :  { %v2578_v19 = vsub.f32 %v268_v3, %v325_v57  ;;  %1795 = vmatpush1.bf16.msra.mxu0 %v2563_v43  ;;  %v393_v16 = vand.u32 4294901760, %v392_v60  ;;  %v429_v42 = vand.u32 4294901760, %v428_v55  ;;  %v3192_v40 = vand.u32 4294901760, %v2525_v4 }
 0x2ca   :  { %v416_v17 = vsub.f32 %v2496_v33, %v3190_v1  ;;  %328 = vmatprep.subr.mxu0 %v2555_v2  ;;  %v399_v1 = vand.u32 4294901760, %v398_v50  ;;  %v422_v31 = vsub.f32 %v2538_v9, %v3193_v26  ;;  %v2591_v3 = vand.u32 4294901760, %v288_v45 }
 0x2cb   :  { %v452_v25 = vsub.f32 %v2525_v4, %v3192_v40  ;;  %v3125_v57 = vand.u32 4294901760, %v2566_v28  ;;  %v1796_v8 = vpack.c.bf16 %v405_v54, %v393_v16  ;;  %v3194_v60 = vand.u32 4294901760, %v2355_v44 }
 0x2cc   :  { %v417_v47 = vand.u32 4294901760, %v416_v17  ;;  %v435_v11 = vand.u32 4294901760, %v434_v59  ;;  %v3195_v40 = vand.u32 4294901760, %v2546_v36  ;;  %v1798_v18 = vpack.c.bf16 %v411_v32, %v399_v1 }
 0x2cd   :  { %v440_v55 = vsub.f32 %v2355_v44, %v3194_v60  ;;  %330 = vmatpush1.msra.mxu0 %v2591_v3  ;;  %v2603_v26 = vsub.f32 %v289_v63, %v2555_v2  ;;  %v453_v5 = vand.u32 4294901760, %v452_v25  ;;  %v3196_v54 = vand.u32 4294901760, %v2553_v27 }
 0x2ce   :  { %v458_v50 = vsub.f32 %v2546_v36, %v3195_v40  ;;  %1797 = vmatprep.subr.bf16.mxu0 %v1796_v8  ;;  %383 = vmatmul.mubr.f32.vlgmr.msra.gmra.mrb[0].mxu0 %v382_v7  ;;  %v1800_v17 = vpack.c.bf16 %v429_v42, %v417_v47  ;;  %v423_v16 = vand.u32 4294901760, %v422_v31  ;;  %v469_v60 = vand.u32 4294901760, %v2589_v0 }
 0x2cf   :  { %v476_v59 = vsub.f32 %v2553_v27, %v3196_v54  ;;  %1799 = vmatpush1.bf16.msra.mxu0 %v1798_v18  ;;  %v3197_v40 = vand.u32 4294901760, %v2365_v51  ;;  %v3198_v32 = vmov 0.0   ;;  %v441_v63 = vand.u32 4294901760, %v440_v55 }
 0x2d0   :  { %543 = vmatprep.mubr.f32.mxu0 %v3198_v32  ;;  %1801 = vmatprep.subr.bf16.mxu0 %v1800_v17  ;;  %v464_v47 = vsub.f32 %v2566_v28, %v3125_v57  ;;  %v459_v7 = vand.u32 4294901760, %v458_v50  ;;  %v3199_v8 = vand.u32 4294901760, %v2578_v19  ;;  %v2620_v25 = vsub.f32 %v288_v45, %v2591_v3 }
 0x2d1   :  { %v446_v20 = vsub.f32 %v2365_v51, %v3197_v40  ;;  %v1802_v1 = vpack.c.bf16 %v435_v11, %v423_v16  ;;  %v1804_v31 = vpack.c.bf16 %v453_v5, %v441_v63  ;;  %v477_v18 = vand.u32 4294901760, %v476_v59 }
 0x2d2   :  { %v482_v42 = vsub.f32 %v2578_v19, %v3199_v8  ;;  %v487_v54 = vand.u32 4294901760, %v2603_v26  ;;  %v470_v55 = vsub.f32 %v2589_v0, %v469_v60  ;;  %v465_v50 = vand.u32 4294901760, %v464_v47 }
 0x2d3   :  { %1803 = vmatpush1.bf16.msra.mxu0 %v1802_v1  ;;  %v447_v17 = vand.u32 4294901760, %v446_v20  ;;  %v493_v57 = vand.u32 4294901760, %v2620_v25  ;;  %v1812_v63 = vpack.c.bf16 %v2448_v52, %v2428_v41  ;;  %v1814_v47 = vpack.c.bf16 %v2438_v49, %v2454_v6 }
 0x2d4   :  { %1805 = vmatprep.subr.bf16.mxu0 %v1804_v31  ;;  %v483_v40 = vand.u32 4294901760, %v482_v42  ;;  %v1808_v53 = vpack.c.bf16 %v477_v18, %v465_v50  ;;  %v488_v11 = vsub.f32 %v2603_v26, %v487_v54  ;;  %v471_v45 = vand.u32 4294901760, %v470_v55 }
 0x2d5   :  { %v1806_v8 = vpack.c.bf16 %v459_v7, %v447_v17  ;;  %v494_v59 = vsub.f32 %v2620_v25, %v493_v57  ;;  %v1818_v7 = vpack.c.bf16 %v2508_v46, %v2538_v9  ;;  %v1820_v42 = vpack.c.bf16 %v2525_v4, %v2355_v44 }
 0x2d6   :  { %v1810_v5 = vpack.c.bf16 %v483_v40, %v471_v45  ;;  %v489_v20 = vand.u32 4294901760, %v488_v11  ;;  %v1822_v1 = vpack.c.bf16 %v2546_v36, %v2365_v51  ;;  %v1824_v31 = vpack.c.bf16 %v2553_v27, %v2566_v28 }
 0x2d7   :  { %1807 = vmatpush1.bf16.msra.mxu0 %v1806_v8  ;;  %v495_v16 = vand.u32 4294901760, %v494_v59  ;;  %v1826_v18 = vpack.c.bf16 %v2578_v19, %v2589_v0  ;;  %v3200_v55 = vand.u32 4294901760, %v2428_v41  ;;  %v3201_v17 = vand.u32 4294901760, %v2448_v52 }
 0x2d8   :  { %1809 = vmatprep.subr.bf16.mxu0 %v1808_v53  ;;  %v1816_v53 = vpack.c.bf16 %v2463_v10, %v2496_v33  ;;  %v3202_v40 = vand.u32 4294901760, %v2454_v6  ;;  %v3203_v8 = vand.u32 4294901760, %v2438_v49  ;;  %v3204_v45 = vand.u32 4294901760, %v2423_v39 }
 0x2d9   :  { %v1844_v50 = vpack.c.bf16 %v3201_v17, %v3200_v55  ;;  %v3206_v59 = vand.u32 4294901760, %v2463_v10  ;;  %v3207_v41 = vand.u32 4294901760, %v2538_v9  ;;  %v3208_v52 = vand.u32 4294901760, %v2508_v46 }
 0x2da   :  { %v1846_v11 = vpack.c.bf16 %v3203_v8, %v3202_v40  ;;  %v3209_v49 = vand.u32 4294901760, %v2355_v44  ;;  %v3212_v10 = vand.u32 4294901760, %v2546_v36  ;;  %v3215_v44 = vand.u32 4294901760, %v2578_v19  ;;  %v293_v36 = vpop.permute.xlu0 %292 }
 0x2db   :  { %1811 = vmatpush1.bf16.msra.mxu0 %v1810_v5  ;;  %v3205_v5 = vand.u32 4294901760, %v2496_v33  ;;  %v1850_v6 = vpack.c.bf16 %v3208_v52, %v3207_v41  ;;  %v3211_v33 = vand.u32 4294901760, %v2365_v51  ;;  %vm3216_vm11 = vcmask 7168  }
 0x2dc   :  { %490 = vmatprep.subr.mxu0 %v489_v20  ;;  %v1858_v46 = vpack.c.bf16 %v3215_v44, %v469_v60  ;;  %vm3217_vm4 = vcmask 1043456   ;;  %vm3220_vm8 = vcmp.lt.s32.totalorder %v2201_v48, 16 }
 0x2dd   :  { %v1848_v20 = vpack.c.bf16 %v3206_v59, %v3205_v5  ;;  %vm3221_vm7 = vmmov %vm3220_vm8 }
 0x2df   :  { %496 = vmatpush1.msra.mxu0 %v495_v16  ;;  %v3210_v16 = vand.u32 4294901760, %v2525_v4 }
 0x2e0   :  { %1813 = vmatprep.subr.bf16.mxu0 %v1812_v63  ;;  %545 = vmatmul.mubr.f32.vlgmr.msra.gmra.mrb[0].mxu0 %v2392_v12  ;;  %v1854_v63 = vpack.c.bf16 %v3212_v10, %v3211_v33 }
 0x2e1   :  { %1815 = vmatpush1.bf16.msra.mxu0 %v1814_v47  ;;  %651 = vmatprep.mubr.f32.mxu0 %v3198_v32  ;;  %v3213_v47 = vand.u32 4294901760, %v2566_v28 }
 0x2e2   :  { %1817 = vmatprep.subr.bf16.mxu0 %v1816_v53  ;;  %v3214_v53 = vand.u32 4294901760, %v2553_v27 }
 0x2e4   :  { %v1856_v9 = vpack.c.bf16 %v3214_v53, %v3213_v47 }
 0x2e5   :  { %1819 = vmatpush1.bf16.msra.mxu0 %v1818_v7 }
 0x2e6   :  { %1821 = vmatprep.subr.bf16.mxu0 %v1820_v42 }
 0x2e9   :  { %1823 = vmatpush1.bf16.msra.mxu0 %v1822_v1 }
 0x2ea   :  { %1825 = vmatprep.subr.bf16.mxu0 %v1824_v31 }
 0x2ed   :  { %1827 = vmatpush1.bf16.msra.mxu0 %v1826_v18 }
 0x2ee   :  { %601 = vmatprep.subr.mxu0 %v2603_v26 }
 0x2f1   :  { %604 = vmatpush1.msra.mxu0 %v2620_v25 }
 0x2f2   :  { %1829 = vmatprep.subr.bf16.mxu0 %v2277_v13  ;;  %654 = vmatmul.mubr.f32.vlgmr.msra.gmra.mrb[0].mxu0 %v2423_v39  ;;  %v1852_v39 = vpack.c.bf16 %v3210_v16, %v3209_v49 }
 0x2f3   :  { %1831 = vmatpush1.bf16.msra.mxu0 %v2283_v14  ;;  %742 = vmatprep.mubr.f32.mxu0 %v3198_v32 }
 0x2f4   :  { %1833 = vmatprep.subr.bf16.mxu0 %v2394_v15 }
 0x2f7   :  { %1835 = vmatpush1.bf16.msra.mxu0 %v2398_v38 }
 0x2f8   :  { %1837 = vmatprep.subr.bf16.mxu0 %v2476_v22 }
 0x2fb   :  { %1839 = vmatpush1.bf16.msra.mxu0 %v2480_v23 }
 0x2fc   :  { %1841 = vmatprep.subr.bf16.mxu0 %v2557_v34 }
 0x2ff   :  { %1843 = vmatpush1.bf16.msra.mxu0 %v2563_v43 }
 0x300   :  { %693 = vmatprep.subr.mxu0 %v2555_v2 }
 0x303   :  { %695 = vmatpush1.msra.mxu0 %v2591_v3 }
 0x304   :  { %1845 = vmatprep.subr.bf16.mxu0 %v1844_v50  ;;  %746 = vmatmul.mubr.f32.vlgmr.msra.gmra.mrb[0].mxu0 %v3204_v45 }
 0x305   :  { %1847 = vmatpush1.bf16.msra.mxu0 %v1846_v11  ;;  %870 = vmatprep.mubr.f32.mxu0 %v3198_v32 }
 0x306   :  { %1849 = vmatprep.subr.bf16.mxu0 %v1848_v20 }
 0x309   :  { %1851 = vmatpush1.bf16.msra.mxu0 %v1850_v6 }
 0x30a   :  { %1853 = vmatprep.subr.bf16.mxu0 %v1852_v39 }
 0x30d   :  { %1855 = vmatpush1.bf16.msra.mxu0 %v1854_v63 }
 0x30e   :  { %1857 = vmatprep.subr.bf16.mxu0 %v1856_v9 }
 0x311   :  { %1859 = vmatpush1.bf16.msra.mxu0 %v1858_v46 }
 0x312   :  { %819 = vmatprep.subr.mxu0 %v487_v54 }
 0x315   :  { %823 = vmatpush1.msra.mxu0 %v493_v57 }
 0x316   :  { %1861 = vmatprep.subr.bf16.mxu0 %v2277_v13  ;;  %872 = vmatmul.mubr.f32.vlgmr.msra.gmra.mrb[0].mxu0 %v2392_v12 }
 0x317   :  { %1863 = vmatpush1.bf16.msra.mxu0 %v2283_v14  ;;  %960 = vmatprep.mubr.f32.mxu0 %v3198_v32 }
 0x318   :  { %1865 = vmatprep.subr.bf16.mxu0 %v2394_v15 }
 0x31b   :  { %1867 = vmatpush1.bf16.msra.mxu0 %v2398_v38 }
 0x31c   :  { %1869 = vmatprep.subr.bf16.mxu0 %v2476_v22 }
 0x31f   :  { %1871 = vmatpush1.bf16.msra.mxu0 %v2480_v23 }
 0x320   :  { %1873 = vmatprep.subr.bf16.mxu0 %v2557_v34 }
 0x323   :  { %1875 = vmatpush1.bf16.msra.mxu0 %v2563_v43 }
 0x324   :  { %911 = vmatprep.subr.mxu0 %v2555_v2 }
 0x327   :  { %913 = vmatpush1.msra.mxu0 %v2591_v3 }
 0x328   :  { %962 = vmatmul.mubr.f32.vlgmr.msra.gmra.mrb[0].mxu0 %v2392_v12 }
 0x3fb   :  { %v963_v13 = vpop.f32.mrb[0].mxu0 }
 0x3fc   :  { %v1972_v14 = vadd.f32 %v963_v13, %v293_v36  ;;  %v965_v51 = vpop.f32.mrb[1].mxu0  ;;  %v2787_v13 = vand.u32 4294901760, %v1018_v58 }
 0x3fd   :  { %v1973_v15 = vadd.f32 %v965_v51, %v293_v36 }
 0x3fe   :  { %v971_v38 = vmul.f32 %v1972_v14, %v1972_v14 }
 0x3ff   :  { %v968_v0 = vadd.f32 %v1973_v15, %v1972_v14  ;;  %v972_v22 = vmul.f32 %v1973_v15, %v1973_v15 }
 0x401   :  { %969 = vadd.xlane.f32.xlu1 %v968_v0  ;;  %v973_v23 = vadd.f32 %v972_v22, %v971_v38 }
 0x403   :  { %974 = vadd.xlane.f32.xlu0 %v973_v23 }
 0x48e   :  { %v970_v34 = vpop.xlane.xlu1 %969 }
 0x490   :  { %v975_v4 = vpop.xlane.xlu0 %974 }
 0x491   :  { %v976_v43 = vsel %vm3216_vm11, %v970_v34, %v975_v4  ;;  %vm3218_vm11 = vcmp.lt.s32.totalorder %v2201_v48, 17 }
 0x492   :  { %v978_v2 = vrot.slane %v976_v43, 4 }
 0x494   :  { %v980_v27 = vadd.f32 %v978_v2, %v976_v43  ;;  %v2808_v2 = vsub.f32 %v1018_v58, %v2787_v13 }
 0x496   :  { %v982_v28 = vrot.slane %v980_v27, 4 }
 0x498   :  { %v984_v12 = vsel %vm3217_vm4, %v980_v27, %v982_v28  ;;  %vm3219_vm4 = vmmov %vm3218_vm11 }
 0x499   :  { %v985_v19 = vmul.f32 0.001953125, %v984_v12 }
 0x49b   :  { %v986_v3 = vmul.f32 %v985_v19, %v985_v19 }
 0x49d   :  { %988 = vrot.lane.b32.xlu0 %v986_v3, %s2039_s13 }
 0x50f   :  { %v989_v57 = vpop.permute.xlu0 %988 }
 0x510   :  { %v991_v26 = vsub.f32 %v985_v19, %v989_v57 }
 0x512   :  { %v992_v60 = vmax.f32 %v991_v26, 0.0 }
 0x514   :  { %v993_v25 = vadd.f32 1e-05, %v992_v60  ;;  %v3228_v60 = vld [vmem:[#allocation5_spill] sm:$0xff] }
 0x516   :  { %2011 = vrsqrt.f32 %v993_v25 }
 0x520   :  { %v2012_v54 = vpop.eup %2011 }
 0x521   :  { %996 = vrot.lane.b32.xlu1 %v2012_v54, %s2041_s14  ;;  %v3230_v54 = vld [vmem:[#allocation6_spill] sm:$0xff] }
 0x593   :  { %v997_v7 = vpop.permute.xlu1 %996 }
 0x594   :  { %v999_v42 = vmul.f32 %v997_v7, %v2115_v21  ;;  %v1019_v21 = vld [vmem:[%s3096_s8] sm:$0xff] }
 0x596   :  { %v1000_v1 = vmul.f32 %v999_v42, %v985_v19  ;;  %1004 = vperm.xlu1 %2008, %v999_v42  }
 0x598   :  { %v1001_v31 = vsub.f32 %v2121_v24, %v1000_v1 }
 0x59a   :  { %1011 = vperm.xlu0 %2007, %v1001_v31  }
 0x615   :  { %v1005_v18 = vpop.permute.xlu1 %1004 }
 0x616   :  { %v1007_v55 = vmul.f32 %v1972_v14, %v1005_v18  ;;  %v1008_v17 = vmul.f32 %v1973_v15, %v1005_v18 }
 0x619   :  { %v1012_v50 = vpop.permute.xlu0 %1011 }
 0x61a   :  { %v1014_v40 = vadd.f32 %v1012_v50, %v1007_v55  ;;  %v1015_v8 = vadd.f32 %v1012_v50, %v1008_v17  ;;  %v1174_v55 = vand.u32 4294901760, %v2808_v2 }
 0x61c   :  { %v2723_v11 = vmax.f32 %v1014_v40, 0.0  ;;  %v2725_v45 = vmax.f32 %v1015_v8, 0.0 }
 0x61e   :  { %1022 = vrot.lane.b32.xlu0 %v2725_v45, %s2043_s19  ;;  %1020 = vrot.lane.b32.xlu1 %v2723_v11, %s2043_s19  ;;  %v1105_v15 = vand.u32 4294901760, %v2725_v45  ;;  %v1107_v30 = vand.u32 4294901760, %v2723_v11 }
 0x620   :  { %v2811_v3 = vsub.f32 %v2725_v45, %v1105_v15  ;;  %v2828_v18 = vsub.f32 %v2723_v11, %v1107_v30 }
 0x622   :  { %1030 = vrot.lane.b32.xlu0 %v2725_v45, %s2046_s21  ;;  %1028 = vrot.lane.b32.xlu1 %v2723_v11, %s2046_s21 }
 0x626   :  { %1038 = vrot.lane.b32.xlu0 %v2725_v45, %s2047_s24  ;;  %1036 = vrot.lane.b32.xlu1 %v2723_v11, %s2047_s24 }
 0x62a   :  { %1046 = vrot.lane.b32.xlu0 %v2725_v45, %s2039_s13  ;;  %1044 = vrot.lane.b32.xlu1 %v2723_v11, %s2039_s13 }
 0x62e   :  { %1054 = vrot.lane.b32.xlu0 %v2725_v45, %s2041_s14  ;;  %1052 = vrot.lane.b32.xlu1 %v2723_v11, %s2041_s14  ;;  %s2015_s14 = scalar_lea.vmem %s1773_s30, 256 }
 0x62f   :  { %p2016_p0 = scmp.ne.s32.totalorder %s1773_s30, %s2015_s14  ;;  %p2021_p2 = scmp.lt.s32.totalorder %s2015_s14, %s2015_s14 }
 0x631   :  { %p2022_p3 = por %p2021_p2, %p2020_p1 }
 0x632   :  { %1062 = vrot.lane.b32.xlu0 %v2725_v45, %s2042_s3  ;;  %1060 = vrot.lane.b32.xlu1 %v2723_v11, %s2042_s3 }
 0x633   :  { %p2023_p4 = pnand %p2022_p3, %p2016_p0 }
 0x636   :  { %1070 = vrot.lane.b32.xlu0 %v2725_v45, %s2044_s4  ;;  %1068 = vrot.lane.b32.xlu1 %v2723_v11, %s2044_s4 }
 0x63a   :  { %1078 = vrot.lane.b32.xlu0 %v2725_v45, %s2045_s20  ;;  %1076 = vrot.lane.b32.xlu1 %v2723_v11, %s2045_s20 }
 0x63e   :  { %1086 = vperm.xlu1 %2008, %v1019_v21  }
 0x690   :  { %v1023_v24 = vpop.permute.xlu0 %1022  ;;  %v1021_v5 = vpop.permute.xlu1 %1020 }
 0x691   :  { %v1024_v59 = vsel %vm3218_vm11, %v1021_v5, %v1023_v24  ;;  %v1025_v20 = vsel %vm3219_vm4, %v1023_v24, %v1021_v5  ;;  %vm3235_vm11 = vcmp.lt.s32.totalorder %v2201_v48, 112 }
 0x692   :  { %v1026_v6 = vsel %vm2212_vm14, %v1025_v20, 0.0  ;;  %v1027_v49 = vsel %vm2216_vm3, %v1024_v59, 0.0  ;;  %vm3222_vm14 = vcmp.lt.s32.totalorder %v2201_v48, 15  ;;  %vm3236_vm4 = vmmov %vm3235_vm11 }
 0x693   :  { %v1089_v53 = vand.u32 4294901760, %v1027_v49  ;;  %v1091_v56 = vand.u32 4294901760, %v1026_v6  ;;  %vm3223_vm3 = vmmov %vm3222_vm14 }
 0x694   :  { %v1031_v41 = vpop.permute.xlu0 %1030  ;;  %v1029_v52 = vpop.permute.xlu1 %1028 }
 0x695   :  { %v1032_v16 = vsel %vm3220_vm8, %v1029_v52, %v1031_v41  ;;  %v1033_v39 = vsel %vm3221_vm7, %v1031_v41, %v1029_v52  ;;  %v2813_v35 = vsub.f32 %v1027_v49, %v1089_v53  ;;  %v2831_v17 = vsub.f32 %v1026_v6, %v1091_v56 }
 0x696   :  { %v1034_v33 = vsel %vm2226_vm10, %v1033_v39, 0.0  ;;  %v1035_v10 = vsel %vm2230_vm12, %v1032_v16, 0.0  ;;  %vm3224_vm10 = vcmp.lt.s32.totalorder %v2201_v48, 1  ;;  %vm3232_vm7 = vcmp.lt.s32.totalorder %v2201_v48, 113 }
 0x697   :  { %v1093_v63 = vand.u32 4294901760, %v1035_v10  ;;  %v1095_v47 = vand.u32 4294901760, %v1034_v33  ;;  %vm3225_vm12 = vmmov %vm3224_vm10  ;;  %v1185_v21 = vand.u32 4294901760, %v2813_v35  ;;  %v2852_v41 = vsub.f32 %v2808_v2, %v1174_v55 }
 0x698   :  { %v1039_v9 = vpop.permute.xlu0 %1038  ;;  %v1037_v44 = vpop.permute.xlu1 %1036  ;;  %v1233_v52 = vand.u32 4294901760, %v2811_v3  ;;  %v1239_v6 = vand.u32 4294901760, %v2828_v18  ;;  %v1191_v49 = vand.u32 4294901760, %v2831_v17  ;;  %vm3233_vm8 = vmmov %vm3232_vm7 }
 0x699   :  { %v1040_v46 = vsel %vm3222_vm14, %v1037_v44, %v1039_v9  ;;  %v2783_v36 = vpack.c.bf16 %v1093_v63, %v1089_v53  ;;  %v2785_v61 = vpack.c.bf16 %v1095_v47, %v1091_v56  ;;  %v1041_v62 = vsel %vm3223_vm3, %v1039_v9, %v1037_v44 }
 0x69a   :  { %v1043_v38 = vsel %vm2316_vm2, %v1040_v46, 0.0  ;;  %v1042_v4 = vsel %vm2312_vm1, %v1041_v62, 0.0  ;;  %v2815_v37 = vsub.f32 %v1034_v33, %v1095_v47  ;;  %vm3229_vm1 = vnez %v3228_v60 }
 0x69b   :  { %1877 = vmatprep.subr.bf16.mxu1 %v2783_v36  ;;  %v1097_v27 = vand.u32 4294901760, %v1043_v38  ;;  %v1099_v26 = vand.u32 4294901760, %v1042_v4  ;;  %vm3231_vm2 = vnez %v3230_v54  ;;  %v2833_v50 = vsub.f32 %v1035_v10, %v1093_v63 }
 0x69c   :  { %v1047_v14 = vpop.permute.xlu0 %1046  ;;  %v1045_v51 = vpop.permute.xlu1 %1044  ;;  %1879 = vmatpush1.bf16.msra.mxu1 %v2785_v61  ;;  %v1203_v24 = vand.u32 4294901760, %v2815_v37 }
 0x69d   :  { %v1048_v0 = vsel %vm3224_vm10, %v1045_v51, %v1047_v14  ;;  %v1049_v22 = vsel %vm3225_vm12, %v1047_v14, %v1045_v51  ;;  %v1197_v16 = vand.u32 4294901760, %v2833_v50  ;;  %v2858_v39 = vsub.f32 %v1043_v38, %v1097_v27 }
 0x69e   :  { %v1050_v23 = vsel %vm2327_vm0, %v1049_v22, 0.0  ;;  %v1051_v34 = vsel %vm2331_vm6, %v1048_v0, 0.0  ;;  %vm3226_vm0 = vcmp.lt.s32.totalorder %v2201_v48, 127  ;;  %v1204_v58 = vsub.f32 %v2815_v37, %v1203_v24 }
 0x69f   :  { %v1101_v43 = vand.u32 4294901760, %v1051_v34  ;;  %v1103_v28 = vand.u32 4294901760, %v1050_v23  ;;  %vm3227_vm6 = vmmov %vm3226_vm0 }
 0x6a0   :  { %v1055_v12 = vpop.permute.xlu0 %1054  ;;  %v1053_v19 = vpop.permute.xlu1 %1052 }
 0x6a1   :  { %v1056_v29 = vsel %vm3226_vm0, %v1053_v19, %v1055_v12  ;;  %v1057_v57 = vsel %vm3227_vm6, %v1055_v12, %v1053_v19  ;;  %v2825_v42 = vpack.c.bf16 %v1101_v43, %v1097_v27  ;;  %v2836_v8 = vpack.c.bf16 %v1103_v28, %v1099_v26 }
 0x6a2   :  { %v1058_v25 = vsel %vm3229_vm1, %v1056_v29, 0.0  ;;  %v1059_v7 = vsel %vm3231_vm2, %v1057_v57, 0.0  ;;  %v2847_v20 = vsub.f32 %v1051_v34, %v1101_v43  ;;  %v2863_v47 = vsub.f32 %v1050_v23, %v1103_v28 }
 0x6a3   :  { %v1109_v1 = vand.u32 4294901760, %v1059_v7  ;;  %v1111_v31 = vand.u32 4294901760, %v1058_v25  ;;  %1881 = vmatprep.subr.bf16.mxu1 %v2825_v42  ;;  %v2887_v43 = vsub.f32 %v1042_v4, %v1099_v26  ;;  %v1198_v19 = vsub.f32 %v2833_v50, %v1197_v16  ;;  %v3242_v26 = vld [vmem:[#allocation12_spill] sm:$0xff] }
 0x6a4   :  { %v1063_v40 = vpop.permute.xlu0 %1062  ;;  %v1061_v45 = vpop.permute.xlu1 %1060  ;;  %1883 = vmatpush1.bf16.msra.mxu1 %v2836_v8  ;;  %v1221_v38 = vand.u32 4294901760, %v2847_v20  ;;  %v1209_v29 = vand.u32 4294901760, %v2858_v39  ;;  %v1227_v57 = vand.u32 4294901760, %v2863_v47 }
 0x6a5   :  { %v1065_v11 = vsel %vm3232_vm7, %v1063_v40, %v1061_v45  ;;  %v2843_v5 = vpack.c.bf16 %v1109_v1, %v1105_v15  ;;  %v2845_v59 = vpack.c.bf16 %v1111_v31, %v1107_v30  ;;  %v1064_v33 = vsel %vm3233_vm8, %v1061_v45, %v1063_v40 }
 0x6a6   :  { %v1067_v56 = vsel %vm2456_vm9, %v1065_v11, 0.0  ;;  %v1186_v15 = vsub.f32 %v2813_v35, %v1185_v21  ;;  %v2883_v0 = vsub.f32 %v1059_v7, %v1109_v1  ;;  %v1066_v23 = vsel %vm2417_vm13, %v1064_v33, 0.0 }
 0x6a7   :  { %1885 = vmatprep.subr.bf16.mxu1 %v2843_v5  ;;  %v1113_v30 = vand.u32 4294901760, %v1067_v56  ;;  %v2894_v60 = vsub.f32 %v1058_v25, %v1111_v31  ;;  %v1115_v7 = vand.u32 4294901760, %v1066_v23  ;;  %vm3243_vm13 = vnez %v3242_v26 }
 0x6a8   :  { %v1071_v10 = vpop.permute.xlu0 %1070  ;;  %v1069_v63 = vpop.permute.xlu1 %1068  ;;  %1887 = vmatpush1.bf16.msra.mxu1 %v2845_v59  ;;  %v3129_v45 = vand.u32 4294901760, %v2883_v0  ;;  %v1222_v25 = vsub.f32 %v2847_v20, %v1221_v38  ;;  %v1215_v31 = vand.u32 4294901760, %v2887_v43  ;;  %v1199_v46 = vand.u32 4294901760, %v1198_v19 }
 0x6a9   :  { %v1072_v9 = vsel %vm3235_vm11, %v1069_v63, %v1071_v10  ;;  %v1073_v44 = vsel %vm3236_vm4, %v1071_v10, %v1069_v63  ;;  %v1176_v63 = vand.u32 4294901760, %v2852_v41  ;;  %v2920_v53 = vsub.f32 %v1067_v56, %v1113_v30 }
 0x6aa   :  { %v1074_v62 = vsel %vm2465_vm15, %v1072_v9, 0.0  ;;  %v1075_v51 = vsel %vm2469_vm5, %v1073_v44, 0.0  ;;  %vm3240_vm5 = vcmp.lt.s32.totalorder %v2201_v48, 111  ;;  %v1192_v48 = vsub.f32 %v2831_v17, %v1191_v49  ;;  %v3244_v9 = vld [vmem:[#allocation11_spill] sm:$0xff] }
 0x6ab   :  { %v1117_v34 = vand.u32 4294901760, %v1075_v51  ;;  %v1119_v27 = vand.u32 4294901760, %v1074_v62  ;;  %vm3241_vm15 = vmmov %vm3240_vm5  ;;  %vm3245_vm9 = vnez %v3244_v9  ;;  %v1210_v14 = vsub.f32 %v2858_v39, %v1209_v29 }
 0x6ac   :  { %v1079_v28 = vpop.permute.xlu0 %1078  ;;  %v1077_v12 = vpop.permute.xlu1 %1076  ;;  %v1228_v22 = vsub.f32 %v2863_v47, %v1227_v57  ;;  %v1187_v56 = vand.u32 4294901760, %v1186_v15  ;;  %v1216_v19 = vsub.f32 %v2887_v43, %v1215_v31  ;;  %v1234_v15 = vsub.f32 %v2811_v3, %v1233_v52 }
 0x6ad   :  { %v1081_v54 = vsel %vm3240_vm5, %v1079_v28, %v1077_v12  ;;  %v1080_v4 = vsel %vm3241_vm15, %v1077_v12, %v1079_v28  ;;  %v2902_v40 = vpack.c.bf16 %v1117_v34, %v1113_v30  ;;  %v2905_v11 = vsub.f32 %v1075_v51, %v1117_v34 }
 0x6ae   :  { %v1083_v1 = vsel %vm3243_vm13, %v1081_v54, 0.0  ;;  %v2917_v10 = vpack.c.bf16 %v1119_v27, %v1115_v7  ;;  %v1082_v44 = vsel %vm3245_vm9, %v1080_v4, 0.0  ;;  %v1205_v51 = vand.u32 4294901760, %v1204_v58 }
 0x6af   :  { %v2907_v33 = vand.u32 4294901760, %v1083_v1  ;;  %1889 = vmatprep.subr.bf16.mxu1 %v2902_v40  ;;  %v3130_v34 = vand.u32 4294901760, %v2894_v60  ;;  %v2931_v28 = vsub.f32 %v1074_v62, %v1119_v27  ;;  %v3131_v41 = vand.u32 4294901760, %v2905_v11 }
 0x6b0   :  { %1891 = vmatpush1.bf16.msra.mxu1 %v2917_v10  ;;  %v1223_v30 = vand.u32 4294901760, %v1222_v25  ;;  %v1246_v58 = vsub.f32 %v2883_v0, %v3129_v45  ;;  %v1193_v12 = vand.u32 4294901760, %v1192_v48  ;;  %v2942_v54 = vsub.f32 %v1066_v23, %v1115_v7 }
 0x6b1   :  { %1122 = vmatprep.subr.mxu1 %v2907_v33  ;;  %v2944_v62 = vand.u32 4294901760, %v1082_v44  ;;  %v3133_v27 = vand.u32 4294901760, %v2920_v53  ;;  %v1892_v4 = vpack.c.bf16 %v1199_v46, %v1187_v56  ;;  %v1211_v26 = vand.u32 4294901760, %v1210_v14 }
 0x6b2   :  { %v1229_v25 = vand.u32 4294901760, %v1228_v22  ;;  %v1252_v48 = vsub.f32 %v2894_v60, %v3130_v34  ;;  %v3132_v9 = vand.u32 4294901760, %v2931_v28  ;;  %v1894_v23 = vpack.c.bf16 %v1205_v51, %v1193_v12 }
 0x6b3   :  { %v2956_v7 = vsub.f32 %v1083_v1, %v2907_v33  ;;  %v1896_v46 = vpack.c.bf16 %v1223_v30, %v1211_v26  ;;  %v1247_v14 = vand.u32 4294901760, %v1246_v58  ;;  %v1270_v22 = vsub.f32 %v2905_v11, %v3131_v41 }
 0x6b4   :  { %1124 = vmatpush1.msra.mxu1 %v2944_v62  ;;  %v1217_v56 = vand.u32 4294901760, %v1216_v19  ;;  %v1263_v45 = vand.u32 4294901760, %v2942_v54  ;;  %v1240_v34 = vsub.f32 %v2828_v18, %v1239_v6  ;;  %v1235_v1 = vand.u32 4294901760, %v1234_v15 }
 0x6b5   :  { %1893 = vmatprep.subr.bf16.mxu1 %v1892_v4  ;;  %1177 = vmatmul.mubr.f32.vlgmr.msra.gmra.mrb[0].mxu1 %v1176_v63  ;;  %v1258_v63 = vsub.f32 %v2920_v53, %v3133_v27  ;;  %v1253_v51 = vand.u32 4294901760, %v1252_v48  ;;  %v1276_v30 = vsub.f32 %v2931_v28, %v3132_v9  ;;  %v2973_v58 = vsub.f32 %v1082_v44, %v2944_v62 }
 0x6b6   :  { %1895 = vmatpush1.bf16.msra.mxu1 %v1894_v23  ;;  %1337 = vmatprep.mubr.f32.mxu1 %v3198_v32  ;;  %v1898_v12 = vpack.c.bf16 %v1229_v25, %v1217_v56  ;;  %v1900_v19 = vpack.c.bf16 %v1247_v14, %v1235_v1  ;;  %v1271_v4 = vand.u32 4294901760, %v1270_v22  ;;  %v1281_v26 = vand.u32 4294901760, %v2956_v7 }
 0x6b7   :  { %1897 = vmatprep.subr.bf16.mxu1 %v1896_v46  ;;  %v1264_v15 = vsub.f32 %v2942_v54, %v1263_v45  ;;  %v1241_v23 = vand.u32 4294901760, %v1240_v34  ;;  %v1259_v48 = vand.u32 4294901760, %v1258_v63  ;;  %v1277_v46 = vand.u32 4294901760, %v1276_v30 }
 0x6b8   :  { %v1287_v41 = vand.u32 4294901760, %v2973_v58  ;;  %v1282_v44 = vsub.f32 %v2956_v7, %v1281_v26  ;;  %v1908_v1 = vpack.c.bf16 %v2833_v50, %v2813_v35  ;;  %v1910_v63 = vpack.c.bf16 %v2815_v37, %v2831_v17 }
 0x6b9   :  { %v1902_v9 = vpack.c.bf16 %v1253_v51, %v1241_v23  ;;  %v1904_v27 = vpack.c.bf16 %v1271_v4, %v1259_v48  ;;  %v1265_v25 = vand.u32 4294901760, %v1264_v15  ;;  %v1916_v51 = vpack.c.bf16 %v2883_v0, %v2811_v3 }
 0x6ba   :  { %1899 = vmatpush1.bf16.msra.mxu1 %v1898_v12  ;;  %v1288_v22 = vsub.f32 %v2973_v58, %v1287_v41  ;;  %v1283_v34 = vand.u32 4294901760, %v1282_v44  ;;  %v1918_v30 = vpack.c.bf16 %v2894_v60, %v2828_v18  ;;  %v1920_v12 = vpack.c.bf16 %v2905_v11, %v2920_v53 }
 0x6bb   :  { %1901 = vmatprep.subr.bf16.mxu1 %v1900_v19  ;;  %v1906_v14 = vpack.c.bf16 %v1277_v46, %v1265_v25  ;;  %v1922_v19 = vpack.c.bf16 %v2931_v28, %v2942_v54  ;;  %v1940_v4 = vpack.c.bf16 %v1197_v16, %v1185_v21  ;;  %v1942_v15 = vpack.c.bf16 %v1203_v24, %v1191_v49 }
 0x6bc   :  { %v1289_v56 = vand.u32 4294901760, %v1288_v22  ;;  %v1944_v23 = vpack.c.bf16 %v1221_v38, %v1209_v29  ;;  %v1946_v35 = vpack.c.bf16 %v1227_v57, %v1215_v31  ;;  %v3246_v37 = vand.u32 4294901760, %v2883_v0 }
 0x6bd   :  { %v3248_v50 = vand.u32 4294901760, %v2920_v53  ;;  %v3249_v21 = vand.u32 4294901760, %v2905_v11  ;;  %v3250_v3 = vand.u32 4294901760, %v2931_v28 }
 0x6be   :  { %1903 = vmatpush1.bf16.msra.mxu1 %v1902_v9  ;;  %v1914_v9 = vpack.c.bf16 %v2863_v47, %v2887_v43 }
 0x6bf   :  { %1905 = vmatprep.subr.bf16.mxu1 %v1904_v27  ;;  %v1912_v27 = vpack.c.bf16 %v2847_v20, %v2858_v39  ;;  %v1952_v24 = vpack.c.bf16 %v3249_v21, %v3248_v50  ;;  %v1954_v20 = vpack.c.bf16 %v3250_v3, %v1263_v45 }
 0x6c2   :  { %1907 = vmatpush1.bf16.msra.mxu1 %v1906_v14 }
 0x6c3   :  { %1284 = vmatprep.subr.mxu1 %v1283_v34 }
 0x6c6   :  { %1290 = vmatpush1.msra.mxu1 %v1289_v56 }
 0x6c7   :  { %1909 = vmatprep.subr.bf16.mxu1 %v1908_v1  ;;  %1339 = vmatmul.mubr.f32.vlgmr.msra.gmra.mrb[0].mxu1 %v2787_v13 }
 0x6c8   :  { %1911 = vmatpush1.bf16.msra.mxu1 %v1910_v63  ;;  %1445 = vmatprep.mubr.f32.mxu1 %v3198_v32 }
 0x6c9   :  { %1913 = vmatprep.subr.bf16.mxu1 %v1912_v27 }
 0x6cc   :  { %1915 = vmatpush1.bf16.msra.mxu1 %v1914_v9 }
 0x6cd   :  { %1917 = vmatprep.subr.bf16.mxu1 %v1916_v51 }
 0x6d0   :  { %1919 = vmatpush1.bf16.msra.mxu1 %v1918_v30 }
 0x6d1   :  { %1921 = vmatprep.subr.bf16.mxu1 %v1920_v12 }
 0x6d4   :  { %1923 = vmatpush1.bf16.msra.mxu1 %v1922_v19 }
 0x6d5   :  { %1395 = vmatprep.subr.mxu1 %v2956_v7 }
 0x6d8   :  { %1398 = vmatpush1.msra.mxu1 %v2973_v58 }
 0x6d9   :  { %1925 = vmatprep.subr.bf16.mxu1 %v2783_v36  ;;  %1448 = vmatmul.mubr.f32.vlgmr.msra.gmra.mrb[0].mxu1 %v2808_v2  ;;  %v1948_v2 = vpack.c.bf16 %v3246_v37, %v1233_v52 }
 0x6da   :  { %1927 = vmatpush1.bf16.msra.mxu1 %v2785_v61  ;;  %1536 = vmatprep.mubr.f32.mxu1 %v3198_v32 }
 0x6db   :  { %1929 = vmatprep.subr.bf16.mxu1 %v2825_v42 }
 0x6de   :  { %1931 = vmatpush1.bf16.msra.mxu1 %v2836_v8 }
 0x6df   :  { %1933 = vmatprep.subr.bf16.mxu1 %v2843_v5 }
 0x6e2   :  { %1935 = vmatpush1.bf16.msra.mxu1 %v2845_v59 }
 0x6e3   :  { %1937 = vmatprep.subr.bf16.mxu1 %v2902_v40 }
 0x6e6   :  { %1939 = vmatpush1.bf16.msra.mxu1 %v2917_v10 }
 0x6e7   :  { %1487 = vmatprep.subr.mxu1 %v2907_v33 }
 0x6ea   :  { %1489 = vmatpush1.msra.mxu1 %v2944_v62 }
 0x6eb   :  { %1941 = vmatprep.subr.bf16.mxu1 %v1940_v4  ;;  %1540 = vmatmul.mubr.f32.vlgmr.msra.gmra.mrb[0].mxu1 %v1174_v55  ;;  %v3247_v55 = vand.u32 4294901760, %v2894_v60 }
 0x6ec   :  { %1943 = vmatpush1.bf16.msra.mxu1 %v1942_v15  ;;  %1664 = vmatprep.mubr.f32.mxu1 %v3198_v32 }
 0x6ed   :  { %1945 = vmatprep.subr.bf16.mxu1 %v1944_v23  ;;  %v1950_v17 = vpack.c.bf16 %v3247_v55, %v1239_v6 }
 0x6f0   :  { %1947 = vmatpush1.bf16.msra.mxu1 %v1946_v35 }
 0x6f1   :  { %1949 = vmatprep.subr.bf16.mxu1 %v1948_v2 }
 0x6f4   :  { %1951 = vmatpush1.bf16.msra.mxu1 %v1950_v17 }
 0x6f5   :  { %1953 = vmatprep.subr.bf16.mxu1 %v1952_v24 }
 0x6f8   :  { %1955 = vmatpush1.bf16.msra.mxu1 %v1954_v20 }
 0x6f9   :  { %1613 = vmatprep.subr.mxu1 %v1281_v26 }
 0x6fc   :  { %1617 = vmatpush1.msra.mxu1 %v1287_v41 }
 0x6fd   :  { %1957 = vmatprep.subr.bf16.mxu1 %v2783_v36  ;;  %1666 = vmatmul.mubr.f32.vlgmr.msra.gmra.mrb[0].mxu1 %v2787_v13  ;;  %v1087_v36 = vpop.permute.xlu1 %1086 }
 0x6fe   :  { %1959 = vmatpush1.bf16.msra.mxu1 %v2785_v61  ;;  %1754 = vmatprep.mubr.f32.mxu1 %v3198_v32 }
 0x6ff   :  { %1961 = vmatprep.subr.bf16.mxu1 %v2825_v42 }
 0x702   :  { %1963 = vmatpush1.bf16.msra.mxu1 %v2836_v8  ;;  %v2013_v8 = vld [vmem:[%s3088_s0] sm:$0xff] }
 0x703   :  { %1965 = vmatprep.subr.bf16.mxu1 %v2843_v5 }
 0x706   :  { %1967 = vmatpush1.bf16.msra.mxu1 %v2845_v59  ;;  %v2014_v59 = vld [vmem:[%s3088_s0 + $0x8] sm:$0xff] }
 0x707   :  { %1969 = vmatprep.subr.bf16.mxu1 %v2902_v40 }
 0x70a   :  { %1971 = vmatpush1.bf16.msra.mxu1 %v2917_v10 }
 0x70b   :  { %1705 = vmatprep.subr.mxu1 %v2907_v33 }
 0x70e   :  { %1707 = vmatpush1.msra.mxu1 %v2944_v62 }
 0x70f   :  { %1756 = vmatmul.mubr.f32.vlgmr.msra.gmra.mrb[0].mxu1 %v2787_v13 }
 0x7e2   :  { %v1757_v32 = vpop.f32.mrb[0].mxu1 }
 0x7e3   :  { %v1974_v61 = vadd.f32 %v1757_v32, %v1087_v36  ;;  %v1759_v42 = vpop.f32.mrb[1].mxu1 }
 0x7e4   :  { %v1975_v18 = vadd.f32 %v1759_v42, %v1087_v36 }
 0x7e5   :  { %v1762_v5 = vadd.f32 %v2013_v8, %v1974_v61 }
 0x7e6   :  { %v1763_v52 = vadd.f32 %v2014_v59, %v1975_v18 }
 0x7e7   :  { %1764 = vst [vmem:[#allocation2] sm:$0xff] %v1762_v5 }
 0x7e8   :  { %1765 = vst [vmem:[#allocation2 + $0x8] sm:$0xff] %v1763_v52 }
 0x7e9   :  { %2026 = shalt.err (!%p2023_p4)
}
 0x7ea   :  { %s2027_s17 = scalar_lea.hbm %s3097_s9, 256 }
 0x7eb   :  { %p2028_p5 = scmp.ne.s32.totalorder %s3097_s9, %s2027_s17  ;;  %p2031_p6 = scmp.lt.u32.totalorder %s2027_s17, %s3097_s9 }
 0x7ed   :  { %p2033_p7 = pnand %p2031_p6, %p2028_p5 }
 0x7ef   :  { %2036 = shalt.err (!%p2033_p7)
}
 0x7f0   :  { %1775 = dma.vmem_to_hbm [thread:$0]  %s1773_s30, 256, %s3097_s9, [#allocation3]  }
 0x7f1   :  { %2037 = dma.done.wait [#allocation3], 256  }
 0x7f2   :  { %2038 = vsyncadd [#allocation3], 4294967040 }
 0x7f3   :  { %1779 = vsyncpa [#allocation3], 1 }

</bundles_post_ra>
